<compile_context>
chip_gen: v5e
topology: v5e:2x2
jax: 0.10.0
libtpu: 0.0.40
codegen_flags: <defaults>
</compile_context>

<pallas_src>
import functools

import jax
import jax.numpy as jnp
from jax.experimental import pallas as pl
from jax.experimental.pallas import tpu as pltpu


def _gelu_tanh(x):
    c = 0.7978845608028654  # sqrt(2/pi)
    return 0.5 * x * (1.0 + jnp.tanh(c * (x + 0.044715 * x * x * x)))


def decoder_layer_kernel(
        x_ref, m_ref,
        ln1_g_ref, ln1_b_ref,
        wq_ref, wk_ref, wv_ref, wo_ref, bo_ref,
        ln2_g_ref, ln2_b_ref,
        wf1_ref, bf1_ref, wf2_ref, bf2_ref,
        o_ref,
        attn_scr,
        *, batch, n, nm, heads, scale, eps):
    dim = x_ref.shape[-1]
    inner = wq_ref.shape[-1]
    d = inner // heads

    x = x_ref[...]            # (batch*n, dim), native dtype
    m = m_ref[...]            # (batch*nm, dim)

    def layer_norm(t, g_ref, b_ref):
        tf = t.astype(jnp.float32)
        mu = jnp.mean(tf, axis=-1, keepdims=True)
        var = jnp.mean(jnp.square(tf - mu), axis=-1, keepdims=True)
        th = (tf - mu) * jax.lax.rsqrt(var + eps)
        y = th * g_ref[...].astype(jnp.float32) + b_ref[...].astype(jnp.float32)
        return y.astype(t.dtype)

    # PreNorm2: the SAME LayerNorm is applied to both x (queries) and m (memory).
    xn = layer_norm(x, ln1_g_ref, ln1_b_ref)
    mn = layer_norm(m, ln1_g_ref, ln1_b_ref)

    # Q/K/V projections on the full (batch*rows) slab; native-dtype MXU operands,
    # f32 accumulation. Scale folded into q once (cheaper than scaling scores).
    wq = wq_ref[...]
    wk = wk_ref[...]
    wv = wv_ref[...]
    wo = wo_ref[...]
    q = (jnp.dot(xn, wq, preferred_element_type=jnp.float32) * scale).astype(x.dtype)
    k = jnp.dot(mn, wk, preferred_element_type=jnp.float32).astype(x.dtype)
    v = jnp.dot(mn, wv, preferred_element_type=jnp.float32).astype(x.dtype)

    bo = bo_ref[...].astype(jnp.float32)   # (1, dim)

    # Attention core: per (batch, head), accumulate each head directly into the
    # output projection (no concatenate of head outputs).
    contract_last = (((1,), (1,)), ((), ()))   # contract last axes, no batch dims
    for bi in range(batch):
        q_b = q[bi * n:(bi + 1) * n, :]        # (n, inner)
        k_b = k[bi * nm:(bi + 1) * nm, :]      # (nm, inner)
        v_b = v[bi * nm:(bi + 1) * nm, :]
        y_b = jnp.zeros((n, dim), jnp.float32)
        for h in range(heads):
            qh = q_b[:, h * d:(h + 1) * d]     # (n, d)
            kh = k_b[:, h * d:(h + 1) * d]     # (nm, d)
            vh = v_b[:, h * d:(h + 1) * d]
            dots = jax.lax.dot_general(qh, kh, contract_last,
                                       preferred_element_type=jnp.float32)  # (n, nm)
            dots = dots - jnp.max(dots, axis=-1, keepdims=True)
            e = jnp.exp(dots)
            p = e * pl.reciprocal(jnp.sum(e, axis=-1, keepdims=True), approx=True)
            ho = jnp.dot(p.astype(vh.dtype), vh,
                         preferred_element_type=jnp.float32)                # (n, d)
            y_b = y_b + jnp.dot(ho.astype(wo.dtype), wo[h * d:(h + 1) * d, :],
                                preferred_element_type=jnp.float32)         # (n, dim)
        attn_scr[bi * n:(bi + 1) * n, :] = y_b + bo

    # Residual 1.
    h1 = (x.astype(jnp.float32) + attn_scr[...]).astype(x.dtype)            # (batch*n, dim)

    # PreNorm + FeedForward (Linear -> GELU -> Linear); Dropout(p=0) == identity.
    h1n = layer_norm(h1, ln2_g_ref, ln2_b_ref)
    hid = jnp.dot(h1n, wf1_ref[...], preferred_element_type=jnp.float32) \
        + bf1_ref[...].astype(jnp.float32)
    hid = _gelu_tanh(hid).astype(x.dtype)
    ffn = jnp.dot(hid, wf2_ref[...], preferred_element_type=jnp.float32) \
        + bf2_ref[...].astype(jnp.float32)

    # Residual 2.
    o_ref[...] = (h1.astype(jnp.float32) + ffn).astype(o_ref.dtype)


def decoder_layer(x_flat, m_flat, params, *, batch, n, nm, heads, scale, eps=1e-5):
    dim = x_flat.shape[-1]
    kernel = functools.partial(decoder_layer_kernel, batch=batch, n=n, nm=nm,
                               heads=heads, scale=scale, eps=eps)
    return pl.pallas_call(
        kernel,
        out_shape=jax.ShapeDtypeStruct((batch * n, dim), x_flat.dtype),
        scratch_shapes=[pltpu.VMEM((batch * n, dim), jnp.float32)],
    )(x_flat, m_flat, *params)


def transformer_decoder(x, m, layer_params, *, heads, scale, eps=1e-5):
    b, n, dim = x.shape
    nm = m.shape[1]
    xf = x.reshape(b * n, dim)
    mf = m.reshape(b * nm, dim)
    for params in layer_params:
        xf = decoder_layer(xf, mf, params, batch=b, n=n, nm=nm,
                           heads=heads, scale=scale, eps=eps)
    return xf.reshape(b, n, dim)


def transformer_decoder_ref(x, m, layer_params, *, heads, scale, eps=1e-5):
    """Pure-JAX reference mirroring the PyTorch forward (mask=None, dropout=0)."""
    def ln(t, g, bta):
        mu = jnp.mean(t, axis=-1, keepdims=True)
        var = jnp.mean(jnp.square(t - mu), axis=-1, keepdims=True)
        return (t - mu) * jax.lax.rsqrt(var + eps) * g + bta

    b, n, dim = x.shape
    nm = m.shape[1]
    for (g1, b1, wq, wk, wv, wo, bo, g2, b2, w1, c1, w2, c2) in layer_params:
        inner = wq.shape[1]
        d = inner // heads
        xn = ln(x, g1, b1)
        mn = ln(m, g1, b1)
        q = (xn @ wq).reshape(b, n, heads, d).transpose(0, 2, 1, 3)
        k = (mn @ wk).reshape(b, nm, heads, d).transpose(0, 2, 1, 3)
        v = (mn @ wv).reshape(b, nm, heads, d).transpose(0, 2, 1, 3)
        dots = jnp.einsum('bhid,bhjd->bhij', q, k) * scale
        attn = jax.nn.softmax(dots, axis=-1)
        out = jnp.einsum('bhij,bhjd->bhid', attn, v)
        out = out.transpose(0, 2, 1, 3).reshape(b, n, inner)
        x = x + (out @ wo + bo)
        xn2 = ln(x, g2, b2)
        x = x + (_gelu_tanh(xn2 @ w1 + c1) @ w2 + c2)
    return x


if __name__ == "__main__":
    # Small shapes consistent with the module.
    b, n, nm = 2, 8, 8
    dim, heads, dim_head, mlp_dim, depth = 32, 4, 16, 64, 2
    inner = heads * dim_head
    scale = dim ** (-0.5)   # the module defines scale = dim**-0.5 (not dim_head**-0.5)

    key = jax.random.PRNGKey(0)
    key, kx, km = jax.random.split(key, 3)
    x = jax.random.normal(kx, (b, n, dim), dtype=jnp.float32)
    m = jax.random.normal(km, (b, nm, dim), dtype=jnp.float32)

    layer_params = []
    for _ in range(depth):
        key, *ks = jax.random.split(key, 14)
        g1 = 1.0 + 0.1 * jax.random.normal(ks[0], (1, dim), jnp.float32)
        b1 = 0.05 * jax.random.normal(ks[1], (1, dim), jnp.float32)
        wq = 0.05 * jax.random.normal(ks[2], (dim, inner), jnp.float32)
        wk = 0.05 * jax.random.normal(ks[3], (dim, inner), jnp.float32)
        wv = 0.05 * jax.random.normal(ks[4], (dim, inner), jnp.float32)
        wo = 0.05 * jax.random.normal(ks[5], (inner, dim), jnp.float32)
        bo = 0.05 * jax.random.normal(ks[6], (1, dim), jnp.float32)
        g2 = 1.0 + 0.1 * jax.random.normal(ks[7], (1, dim), jnp.float32)
        b2 = 0.05 * jax.random.normal(ks[8], (1, dim), jnp.float32)
        w1 = 0.05 * jax.random.normal(ks[9], (dim, mlp_dim), jnp.float32)
        c1 = 0.05 * jax.random.normal(ks[10], (1, mlp_dim), jnp.float32)
        w2 = 0.05 * jax.random.normal(ks[11], (mlp_dim, dim), jnp.float32)
        c2 = 0.05 * jax.random.normal(ks[12], (1, dim), jnp.float32)
        layer_params.append((g1, b1, wq, wk, wv, wo, bo, g2, b2, w1, c1, w2, c2))

    out = transformer_decoder(x, m, layer_params, heads=heads, scale=scale)
    out = jax.block_until_ready(out)

    ref = transformer_decoder_ref(x, m, layer_params, heads=heads, scale=scale)
    assert out.shape == (b, n, dim)
    assert jnp.allclose(out, ref, atol=2e-3, rtol=2e-3), (
        "mismatch vs pure-JAX reference: max abs err = "
        f"{float(jnp.max(jnp.abs(out - ref)))}")

    print("KERNEL_OK")
</pallas_src>

<mosaic_0001>
module attributes {stable_mosaic.version = 11 : i64} {
  func.func @decoder_layer_kernel(%arg0: memref<16x32xf32, #tpu.memory_space<vmem>>, %arg1: memref<16x32xf32, #tpu.memory_space<vmem>>, %arg2: memref<1x32xf32, #tpu.memory_space<vmem>>, %arg3: memref<1x32xf32, #tpu.memory_space<vmem>>, %arg4: memref<32x64xf32, #tpu.memory_space<vmem>>, %arg5: memref<32x64xf32, #tpu.memory_space<vmem>>, %arg6: memref<32x64xf32, #tpu.memory_space<vmem>>, %arg7: memref<64x32xf32, #tpu.memory_space<vmem>>, %arg8: memref<1x32xf32, #tpu.memory_space<vmem>>, %arg9: memref<1x32xf32, #tpu.memory_space<vmem>>, %arg10: memref<1x32xf32, #tpu.memory_space<vmem>>, %arg11: memref<32x64xf32, #tpu.memory_space<vmem>>, %arg12: memref<1x64xf32, #tpu.memory_space<vmem>>, %arg13: memref<64x32xf32, #tpu.memory_space<vmem>>, %arg14: memref<1x32xf32, #tpu.memory_space<vmem>>, %arg15: memref<16x32xf32, #tpu.memory_space<vmem>>, %arg16: memref<16x32xf32, #tpu.memory_space<vmem>>) attributes {dimension_semantics = [], scalar_prefetch = 0 : i64, scratch_operands = 1 : i64, tpu.core_type = #tpu.core_type<tc>} {
    %c0 = arith.constant 0 : index
    %c0_0 = arith.constant 0 : index
    %0 = vector.load %arg0[%c0, %c0_0] : memref<16x32xf32, #tpu.memory_space<vmem>>, vector<16x32xf32>
    %c0_1 = arith.constant 0 : index
    %c0_2 = arith.constant 0 : index
    %1 = vector.load %arg1[%c0_1, %c0_2] : memref<16x32xf32, #tpu.memory_space<vmem>>, vector<16x32xf32>
    %cst = arith.constant dense<0.000000e+00> : vector<16xf32>
    %2 = vector.multi_reduction <add>, %0, %cst [1] : vector<16x32xf32> to vector<16xf32>
    %3 = vector.shape_cast %2 : vector<16xf32> to vector<16x1xf32>
    %cst_3 = arith.constant 3.200000e+01 : f32
    %4 = vector.broadcast %cst_3 : f32 to vector<16x1xf32>
    %5 = arith.divf %3, %4 : vector<16x1xf32>
    %6 = vector.broadcast %5 : vector<16x1xf32> to vector<16x32xf32>
    %7 = arith.subf %0, %6 : vector<16x32xf32>
    %8 = arith.mulf %7, %7 : vector<16x32xf32>
    %cst_4 = arith.constant dense<0.000000e+00> : vector<16xf32>
    %9 = vector.multi_reduction <add>, %8, %cst_4 [1] : vector<16x32xf32> to vector<16xf32>
    %10 = vector.shape_cast %9 : vector<16xf32> to vector<16x1xf32>
    %cst_5 = arith.constant 3.200000e+01 : f32
    %11 = vector.broadcast %cst_5 : f32 to vector<16x1xf32>
    %12 = arith.divf %10, %11 : vector<16x1xf32>
    %13 = vector.broadcast %5 : vector<16x1xf32> to vector<16x32xf32>
    %14 = arith.subf %0, %13 : vector<16x32xf32>
    %cst_6 = arith.constant 9.99999974E-6 : f32
    %15 = vector.broadcast %cst_6 : f32 to vector<16x1xf32>
    %16 = arith.addf %12, %15 : vector<16x1xf32>
    %17 = math.rsqrt %16 : vector<16x1xf32>
    %18 = vector.broadcast %17 : vector<16x1xf32> to vector<16x32xf32>
    %19 = arith.mulf %14, %18 : vector<16x32xf32>
    %c0_7 = arith.constant 0 : index
    %c0_8 = arith.constant 0 : index
    %20 = vector.load %arg2[%c0_7, %c0_8] : memref<1x32xf32, #tpu.memory_space<vmem>>, vector<1x32xf32>
    %21 = vector.broadcast %20 : vector<1x32xf32> to vector<16x32xf32>
    %22 = arith.mulf %19, %21 : vector<16x32xf32>
    %c0_9 = arith.constant 0 : index
    %c0_10 = arith.constant 0 : index
    %23 = vector.load %arg3[%c0_9, %c0_10] : memref<1x32xf32, #tpu.memory_space<vmem>>, vector<1x32xf32>
    %24 = vector.broadcast %23 : vector<1x32xf32> to vector<16x32xf32>
    %25 = arith.addf %22, %24 : vector<16x32xf32>
    %cst_11 = arith.constant dense<0.000000e+00> : vector<16xf32>
    %26 = vector.multi_reduction <add>, %1, %cst_11 [1] : vector<16x32xf32> to vector<16xf32>
    %27 = vector.shape_cast %26 : vector<16xf32> to vector<16x1xf32>
    %cst_12 = arith.constant 3.200000e+01 : f32
    %28 = vector.broadcast %cst_12 : f32 to vector<16x1xf32>
    %29 = arith.divf %27, %28 : vector<16x1xf32>
    %30 = vector.broadcast %29 : vector<16x1xf32> to vector<16x32xf32>
    %31 = arith.subf %1, %30 : vector<16x32xf32>
    %32 = arith.mulf %31, %31 : vector<16x32xf32>
    %cst_13 = arith.constant dense<0.000000e+00> : vector<16xf32>
    %33 = vector.multi_reduction <add>, %32, %cst_13 [1] : vector<16x32xf32> to vector<16xf32>
    %34 = vector.shape_cast %33 : vector<16xf32> to vector<16x1xf32>
    %cst_14 = arith.constant 3.200000e+01 : f32
    %35 = vector.broadcast %cst_14 : f32 to vector<16x1xf32>
    %36 = arith.divf %34, %35 : vector<16x1xf32>
    %37 = vector.broadcast %29 : vector<16x1xf32> to vector<16x32xf32>
    %38 = arith.subf %1, %37 : vector<16x32xf32>
    %cst_15 = arith.constant 9.99999974E-6 : f32
    %39 = vector.broadcast %cst_15 : f32 to vector<16x1xf32>
    %40 = arith.addf %36, %39 : vector<16x1xf32>
    %41 = math.rsqrt %40 : vector<16x1xf32>
    %42 = vector.broadcast %41 : vector<16x1xf32> to vector<16x32xf32>
    %43 = arith.mulf %38, %42 : vector<16x32xf32>
    %c0_16 = arith.constant 0 : index
    %c0_17 = arith.constant 0 : index
    %44 = vector.load %arg2[%c0_16, %c0_17] : memref<1x32xf32, #tpu.memory_space<vmem>>, vector<1x32xf32>
    %45 = vector.broadcast %44 : vector<1x32xf32> to vector<16x32xf32>
    %46 = arith.mulf %43, %45 : vector<16x32xf32>
    %c0_18 = arith.constant 0 : index
    %c0_19 = arith.constant 0 : index
    %47 = vector.load %arg3[%c0_18, %c0_19] : memref<1x32xf32, #tpu.memory_space<vmem>>, vector<1x32xf32>
    %48 = vector.broadcast %47 : vector<1x32xf32> to vector<16x32xf32>
    %49 = arith.addf %46, %48 : vector<16x32xf32>
    %c0_20 = arith.constant 0 : index
    %c0_21 = arith.constant 0 : index
    %50 = vector.load %arg4[%c0_20, %c0_21] : memref<32x64xf32, #tpu.memory_space<vmem>>, vector<32x64xf32>
    %c0_22 = arith.constant 0 : index
    %c0_23 = arith.constant 0 : index
    %51 = vector.load %arg5[%c0_22, %c0_23] : memref<32x64xf32, #tpu.memory_space<vmem>>, vector<32x64xf32>
    %c0_24 = arith.constant 0 : index
    %c0_25 = arith.constant 0 : index
    %52 = vector.load %arg6[%c0_24, %c0_25] : memref<32x64xf32, #tpu.memory_space<vmem>>, vector<32x64xf32>
    %c0_26 = arith.constant 0 : index
    %c0_27 = arith.constant 0 : index
    %53 = vector.load %arg7[%c0_26, %c0_27] : memref<64x32xf32, #tpu.memory_space<vmem>>, vector<64x32xf32>
    %cst_28 = arith.constant dense<0.000000e+00> : vector<16x64xf32>
    %54 = tpu.matmul %25, %50, %cst_28 {dimension_numbers = #tpu.dot_dimension_numbers<[1], [0], [0], [1], [0, 0, 1, 1], [], []>} : vector<16x32xf32>, vector<32x64xf32>, vector<16x64xf32> -> vector<16x64xf32>
    %cst_29 = arith.constant 0.176776692 : f32
    %55 = vector.broadcast %cst_29 : f32 to vector<16x64xf32>
    %56 = arith.mulf %54, %55 : vector<16x64xf32>
    %cst_30 = arith.constant dense<0.000000e+00> : vector<16x64xf32>
    %57 = tpu.matmul %49, %51, %cst_30 {dimension_numbers = #tpu.dot_dimension_numbers<[1], [0], [0], [1], [0, 0, 1, 1], [], []>} : vector<16x32xf32>, vector<32x64xf32>, vector<16x64xf32> -> vector<16x64xf32>
    %cst_31 = arith.constant dense<0.000000e+00> : vector<16x64xf32>
    %58 = tpu.matmul %49, %52, %cst_31 {dimension_numbers = #tpu.dot_dimension_numbers<[1], [0], [0], [1], [0, 0, 1, 1], [], []>} : vector<16x32xf32>, vector<32x64xf32>, vector<16x64xf32> -> vector<16x64xf32>
    %c0_32 = arith.constant 0 : index
    %c0_33 = arith.constant 0 : index
    %59 = vector.load %arg8[%c0_32, %c0_33] : memref<1x32xf32, #tpu.memory_space<vmem>>, vector<1x32xf32>
    %60 = vector.extract_strided_slice %56 {offsets = [0, 0], sizes = [8, 64], strides = [1, 1]} : vector<16x64xf32> to vector<8x64xf32>
    %61 = vector.extract_strided_slice %57 {offsets = [0, 0], sizes = [8, 64], strides = [1, 1]} : vector<16x64xf32> to vector<8x64xf32>
    %62 = vector.extract_strided_slice %58 {offsets = [0, 0], sizes = [8, 64], strides = [1, 1]} : vector<16x64xf32> to vector<8x64xf32>
    %cst_34 = arith.constant 0.000000e+00 : f32
    %63 = vector.broadcast %cst_34 : f32 to vector<8x32xf32>
    %64 = vector.extract_strided_slice %60 {offsets = [0, 0], sizes = [8, 16], strides = [1, 1]} : vector<8x64xf32> to vector<8x16xf32>
    %65 = vector.extract_strided_slice %61 {offsets = [0, 0], sizes = [8, 16], strides = [1, 1]} : vector<8x64xf32> to vector<8x16xf32>
    %66 = vector.extract_strided_slice %62 {offsets = [0, 0], sizes = [8, 16], strides = [1, 1]} : vector<8x64xf32> to vector<8x16xf32>
    %cst_35 = arith.constant dense<0.000000e+00> : vector<8x8xf32>
    %67 = tpu.matmul %64, %65, %cst_35 {dimension_numbers = #tpu.dot_dimension_numbers<[1], [1], [0], [0], [0, 0, 1, 0], [], []>} : vector<8x16xf32>, vector<8x16xf32>, vector<8x8xf32> -> vector<8x8xf32>
    %cst_36 = arith.constant dense<0xFF800000> : vector<8xf32>
    %68 = vector.multi_reduction <maximumf>, %67, %cst_36 [1] : vector<8x8xf32> to vector<8xf32>
    %69 = vector.shape_cast %68 : vector<8xf32> to vector<8x1xf32>
    %70 = vector.broadcast %69 : vector<8x1xf32> to vector<8x8xf32>
    %71 = arith.subf %67, %70 : vector<8x8xf32>
    %72 = math.exp %71 : vector<8x8xf32>
    %cst_37 = arith.constant dense<0.000000e+00> : vector<8xf32>
    %73 = vector.multi_reduction <add>, %72, %cst_37 [1] : vector<8x8xf32> to vector<8xf32>
    %74 = vector.shape_cast %73 : vector<8xf32> to vector<8x1xf32>
    %75 = tpu.reciprocal %74 {approx = true} : vector<8x1xf32> -> vector<8x1xf32>
    %76 = vector.broadcast %75 : vector<8x1xf32> to vector<8x8xf32>
    %77 = arith.mulf %72, %76 : vector<8x8xf32>
    %cst_38 = arith.constant dense<0.000000e+00> : vector<8x16xf32>
    %78 = tpu.matmul %77, %66, %cst_38 {dimension_numbers = #tpu.dot_dimension_numbers<[1], [0], [0], [1], [0, 0, 1, 1], [], []>} : vector<8x8xf32>, vector<8x16xf32>, vector<8x16xf32> -> vector<8x16xf32>
    %79 = vector.extract_strided_slice %53 {offsets = [0, 0], sizes = [16, 32], strides = [1, 1]} : vector<64x32xf32> to vector<16x32xf32>
    %cst_39 = arith.constant dense<0.000000e+00> : vector<8x32xf32>
    %80 = tpu.matmul %78, %79, %cst_39 {dimension_numbers = #tpu.dot_dimension_numbers<[1], [0], [0], [1], [0, 0, 1, 1], [], []>} : vector<8x16xf32>, vector<16x32xf32>, vector<8x32xf32> -> vector<8x32xf32>
    %81 = arith.addf %63, %80 : vector<8x32xf32>
    %82 = vector.extract_strided_slice %60 {offsets = [0, 16], sizes = [8, 16], strides = [1, 1]} : vector<8x64xf32> to vector<8x16xf32>
    %83 = vector.extract_strided_slice %61 {offsets = [0, 16], sizes = [8, 16], strides = [1, 1]} : vector<8x64xf32> to vector<8x16xf32>
    %84 = vector.extract_strided_slice %62 {offsets = [0, 16], sizes = [8, 16], strides = [1, 1]} : vector<8x64xf32> to vector<8x16xf32>
    %cst_40 = arith.constant dense<0.000000e+00> : vector<8x8xf32>
    %85 = tpu.matmul %82, %83, %cst_40 {dimension_numbers = #tpu.dot_dimension_numbers<[1], [1], [0], [0], [0, 0, 1, 0], [], []>} : vector<8x16xf32>, vector<8x16xf32>, vector<8x8xf32> -> vector<8x8xf32>
    %cst_41 = arith.constant dense<0xFF800000> : vector<8xf32>
    %86 = vector.multi_reduction <maximumf>, %85, %cst_41 [1] : vector<8x8xf32> to vector<8xf32>
    %87 = vector.shape_cast %86 : vector<8xf32> to vector<8x1xf32>
    %88 = vector.broadcast %87 : vector<8x1xf32> to vector<8x8xf32>
    %89 = arith.subf %85, %88 : vector<8x8xf32>
    %90 = math.exp %89 : vector<8x8xf32>
    %cst_42 = arith.constant dense<0.000000e+00> : vector<8xf32>
    %91 = vector.multi_reduction <add>, %90, %cst_42 [1] : vector<8x8xf32> to vector<8xf32>
    %92 = vector.shape_cast %91 : vector<8xf32> to vector<8x1xf32>
    %93 = tpu.reciprocal %92 {approx = true} : vector<8x1xf32> -> vector<8x1xf32>
    %94 = vector.broadcast %93 : vector<8x1xf32> to vector<8x8xf32>
    %95 = arith.mulf %90, %94 : vector<8x8xf32>
    %cst_43 = arith.constant dense<0.000000e+00> : vector<8x16xf32>
    %96 = tpu.matmul %95, %84, %cst_43 {dimension_numbers = #tpu.dot_dimension_numbers<[1], [0], [0], [1], [0, 0, 1, 1], [], []>} : vector<8x8xf32>, vector<8x16xf32>, vector<8x16xf32> -> vector<8x16xf32>
    %97 = vector.extract_strided_slice %53 {offsets = [16, 0], sizes = [16, 32], strides = [1, 1]} : vector<64x32xf32> to vector<16x32xf32>
    %cst_44 = arith.constant dense<0.000000e+00> : vector<8x32xf32>
    %98 = tpu.matmul %96, %97, %cst_44 {dimension_numbers = #tpu.dot_dimension_numbers<[1], [0], [0], [1], [0, 0, 1, 1], [], []>} : vector<8x16xf32>, vector<16x32xf32>, vector<8x32xf32> -> vector<8x32xf32>
    %99 = arith.addf %81, %98 : vector<8x32xf32>
    %100 = vector.extract_strided_slice %60 {offsets = [0, 32], sizes = [8, 16], strides = [1, 1]} : vector<8x64xf32> to vector<8x16xf32>
    %101 = vector.extract_strided_slice %61 {offsets = [0, 32], sizes = [8, 16], strides = [1, 1]} : vector<8x64xf32> to vector<8x16xf32>
    %102 = vector.extract_strided_slice %62 {offsets = [0, 32], sizes = [8, 16], strides = [1, 1]} : vector<8x64xf32> to vector<8x16xf32>
    %cst_45 = arith.constant dense<0.000000e+00> : vector<8x8xf32>
    %103 = tpu.matmul %100, %101, %cst_45 {dimension_numbers = #tpu.dot_dimension_numbers<[1], [1], [0], [0], [0, 0, 1, 0], [], []>} : vector<8x16xf32>, vector<8x16xf32>, vector<8x8xf32> -> vector<8x8xf32>
    %cst_46 = arith.constant dense<0xFF800000> : vector<8xf32>
    %104 = vector.multi_reduction <maximumf>, %103, %cst_46 [1] : vector<8x8xf32> to vector<8xf32>
    %105 = vector.shape_cast %104 : vector<8xf32> to vector<8x1xf32>
    %106 = vector.broadcast %105 : vector<8x1xf32> to vector<8x8xf32>
    %107 = arith.subf %103, %106 : vector<8x8xf32>
    %108 = math.exp %107 : vector<8x8xf32>
    %cst_47 = arith.constant dense<0.000000e+00> : vector<8xf32>
    %109 = vector.multi_reduction <add>, %108, %cst_47 [1] : vector<8x8xf32> to vector<8xf32>
    %110 = vector.shape_cast %109 : vector<8xf32> to vector<8x1xf32>
    %111 = tpu.reciprocal %110 {approx = true} : vector<8x1xf32> -> vector<8x1xf32>
    %112 = vector.broadcast %111 : vector<8x1xf32> to vector<8x8xf32>
    %113 = arith.mulf %108, %112 : vector<8x8xf32>
    %cst_48 = arith.constant dense<0.000000e+00> : vector<8x16xf32>
    %114 = tpu.matmul %113, %102, %cst_48 {dimension_numbers = #tpu.dot_dimension_numbers<[1], [0], [0], [1], [0, 0, 1, 1], [], []>} : vector<8x8xf32>, vector<8x16xf32>, vector<8x16xf32> -> vector<8x16xf32>
    %115 = vector.extract_strided_slice %53 {offsets = [32, 0], sizes = [16, 32], strides = [1, 1]} : vector<64x32xf32> to vector<16x32xf32>
    %cst_49 = arith.constant dense<0.000000e+00> : vector<8x32xf32>
    %116 = tpu.matmul %114, %115, %cst_49 {dimension_numbers = #tpu.dot_dimension_numbers<[1], [0], [0], [1], [0, 0, 1, 1], [], []>} : vector<8x16xf32>, vector<16x32xf32>, vector<8x32xf32> -> vector<8x32xf32>
    %117 = arith.addf %99, %116 : vector<8x32xf32>
    %118 = vector.extract_strided_slice %60 {offsets = [0, 48], sizes = [8, 16], strides = [1, 1]} : vector<8x64xf32> to vector<8x16xf32>
    %119 = vector.extract_strided_slice %61 {offsets = [0, 48], sizes = [8, 16], strides = [1, 1]} : vector<8x64xf32> to vector<8x16xf32>
    %120 = vector.extract_strided_slice %62 {offsets = [0, 48], sizes = [8, 16], strides = [1, 1]} : vector<8x64xf32> to vector<8x16xf32>
    %cst_50 = arith.constant dense<0.000000e+00> : vector<8x8xf32>
    %121 = tpu.matmul %118, %119, %cst_50 {dimension_numbers = #tpu.dot_dimension_numbers<[1], [1], [0], [0], [0, 0, 1, 0], [], []>} : vector<8x16xf32>, vector<8x16xf32>, vector<8x8xf32> -> vector<8x8xf32>
    %cst_51 = arith.constant dense<0xFF800000> : vector<8xf32>
    %122 = vector.multi_reduction <maximumf>, %121, %cst_51 [1] : vector<8x8xf32> to vector<8xf32>
    %123 = vector.shape_cast %122 : vector<8xf32> to vector<8x1xf32>
    %124 = vector.broadcast %123 : vector<8x1xf32> to vector<8x8xf32>
    %125 = arith.subf %121, %124 : vector<8x8xf32>
    %126 = math.exp %125 : vector<8x8xf32>
    %cst_52 = arith.constant dense<0.000000e+00> : vector<8xf32>
    %127 = vector.multi_reduction <add>, %126, %cst_52 [1] : vector<8x8xf32> to vector<8xf32>
    %128 = vector.shape_cast %127 : vector<8xf32> to vector<8x1xf32>
    %129 = tpu.reciprocal %128 {approx = true} : vector<8x1xf32> -> vector<8x1xf32>
    %130 = vector.broadcast %129 : vector<8x1xf32> to vector<8x8xf32>
    %131 = arith.mulf %126, %130 : vector<8x8xf32>
    %cst_53 = arith.constant dense<0.000000e+00> : vector<8x16xf32>
    %132 = tpu.matmul %131, %120, %cst_53 {dimension_numbers = #tpu.dot_dimension_numbers<[1], [0], [0], [1], [0, 0, 1, 1], [], []>} : vector<8x8xf32>, vector<8x16xf32>, vector<8x16xf32> -> vector<8x16xf32>
    %133 = vector.extract_strided_slice %53 {offsets = [48, 0], sizes = [16, 32], strides = [1, 1]} : vector<64x32xf32> to vector<16x32xf32>
    %cst_54 = arith.constant dense<0.000000e+00> : vector<8x32xf32>
    %134 = tpu.matmul %132, %133, %cst_54 {dimension_numbers = #tpu.dot_dimension_numbers<[1], [0], [0], [1], [0, 0, 1, 1], [], []>} : vector<8x16xf32>, vector<16x32xf32>, vector<8x32xf32> -> vector<8x32xf32>
    %135 = arith.addf %117, %134 : vector<8x32xf32>
    %136 = vector.broadcast %59 : vector<1x32xf32> to vector<8x32xf32>
    %137 = arith.addf %135, %136 : vector<8x32xf32>
    %c0_55 = arith.constant 0 : index
    %c0_56 = arith.constant 0 : index
    %138 = vector.load %arg16[%c0_55, %c0_56] : memref<16x32xf32, #tpu.memory_space<vmem>>, vector<8x32xf32>
    tpu.vector_store %arg16[%c0_55, %c0_56], %137 {strides = array<i32>} : memref<16x32xf32, #tpu.memory_space<vmem>>, vector<8x32xf32>,
    %139 = vector.extract_strided_slice %56 {offsets = [8, 0], sizes = [8, 64], strides = [1, 1]} : vector<16x64xf32> to vector<8x64xf32>
    %140 = vector.extract_strided_slice %57 {offsets = [8, 0], sizes = [8, 64], strides = [1, 1]} : vector<16x64xf32> to vector<8x64xf32>
    %141 = vector.extract_strided_slice %58 {offsets = [8, 0], sizes = [8, 64], strides = [1, 1]} : vector<16x64xf32> to vector<8x64xf32>
    %cst_57 = arith.constant 0.000000e+00 : f32
    %142 = vector.broadcast %cst_57 : f32 to vector<8x32xf32>
    %143 = vector.extract_strided_slice %139 {offsets = [0, 0], sizes = [8, 16], strides = [1, 1]} : vector<8x64xf32> to vector<8x16xf32>
    %144 = vector.extract_strided_slice %140 {offsets = [0, 0], sizes = [8, 16], strides = [1, 1]} : vector<8x64xf32> to vector<8x16xf32>
    %145 = vector.extract_strided_slice %141 {offsets = [0, 0], sizes = [8, 16], strides = [1, 1]} : vector<8x64xf32> to vector<8x16xf32>
    %cst_58 = arith.constant dense<0.000000e+00> : vector<8x8xf32>
    %146 = tpu.matmul %143, %144, %cst_58 {dimension_numbers = #tpu.dot_dimension_numbers<[1], [1], [0], [0], [0, 0, 1, 0], [], []>} : vector<8x16xf32>, vector<8x16xf32>, vector<8x8xf32> -> vector<8x8xf32>
    %cst_59 = arith.constant dense<0xFF800000> : vector<8xf32>
    %147 = vector.multi_reduction <maximumf>, %146, %cst_59 [1] : vector<8x8xf32> to vector<8xf32>
    %148 = vector.shape_cast %147 : vector<8xf32> to vector<8x1xf32>
    %149 = vector.broadcast %148 : vector<8x1xf32> to vector<8x8xf32>
    %150 = arith.subf %146, %149 : vector<8x8xf32>
    %151 = math.exp %150 : vector<8x8xf32>
    %cst_60 = arith.constant dense<0.000000e+00> : vector<8xf32>
    %152 = vector.multi_reduction <add>, %151, %cst_60 [1] : vector<8x8xf32> to vector<8xf32>
    %153 = vector.shape_cast %152 : vector<8xf32> to vector<8x1xf32>
    %154 = tpu.reciprocal %153 {approx = true} : vector<8x1xf32> -> vector<8x1xf32>
    %155 = vector.broadcast %154 : vector<8x1xf32> to vector<8x8xf32>
    %156 = arith.mulf %151, %155 : vector<8x8xf32>
    %cst_61 = arith.constant dense<0.000000e+00> : vector<8x16xf32>
    %157 = tpu.matmul %156, %145, %cst_61 {dimension_numbers = #tpu.dot_dimension_numbers<[1], [0], [0], [1], [0, 0, 1, 1], [], []>} : vector<8x8xf32>, vector<8x16xf32>, vector<8x16xf32> -> vector<8x16xf32>
    %158 = vector.extract_strided_slice %53 {offsets = [0, 0], sizes = [16, 32], strides = [1, 1]} : vector<64x32xf32> to vector<16x32xf32>
    %cst_62 = arith.constant dense<0.000000e+00> : vector<8x32xf32>
    %159 = tpu.matmul %157, %158, %cst_62 {dimension_numbers = #tpu.dot_dimension_numbers<[1], [0], [0], [1], [0, 0, 1, 1], [], []>} : vector<8x16xf32>, vector<16x32xf32>, vector<8x32xf32> -> vector<8x32xf32>
    %160 = arith.addf %142, %159 : vector<8x32xf32>
    %161 = vector.extract_strided_slice %139 {offsets = [0, 16], sizes = [8, 16], strides = [1, 1]} : vector<8x64xf32> to vector<8x16xf32>
    %162 = vector.extract_strided_slice %140 {offsets = [0, 16], sizes = [8, 16], strides = [1, 1]} : vector<8x64xf32> to vector<8x16xf32>
    %163 = vector.extract_strided_slice %141 {offsets = [0, 16], sizes = [8, 16], strides = [1, 1]} : vector<8x64xf32> to vector<8x16xf32>
    %cst_63 = arith.constant dense<0.000000e+00> : vector<8x8xf32>
    %164 = tpu.matmul %161, %162, %cst_63 {dimension_numbers = #tpu.dot_dimension_numbers<[1], [1], [0], [0], [0, 0, 1, 0], [], []>} : vector<8x16xf32>, vector<8x16xf32>, vector<8x8xf32> -> vector<8x8xf32>
    %cst_64 = arith.constant dense<0xFF800000> : vector<8xf32>
    %165 = vector.multi_reduction <maximumf>, %164, %cst_64 [1] : vector<8x8xf32> to vector<8xf32>
    %166 = vector.shape_cast %165 : vector<8xf32> to vector<8x1xf32>
    %167 = vector.broadcast %166 : vector<8x1xf32> to vector<8x8xf32>
    %168 = arith.subf %164, %167 : vector<8x8xf32>
    %169 = math.exp %168 : vector<8x8xf32>
    %cst_65 = arith.constant dense<0.000000e+00> : vector<8xf32>
    %170 = vector.multi_reduction <add>, %169, %cst_65 [1] : vector<8x8xf32> to vector<8xf32>
    %171 = vector.shape_cast %170 : vector<8xf32> to vector<8x1xf32>
    %172 = tpu.reciprocal %171 {approx = true} : vector<8x1xf32> -> vector<8x1xf32>
    %173 = vector.broadcast %172 : vector<8x1xf32> to vector<8x8xf32>
    %174 = arith.mulf %169, %173 : vector<8x8xf32>
    %cst_66 = arith.constant dense<0.000000e+00> : vector<8x16xf32>
    %175 = tpu.matmul %174, %163, %cst_66 {dimension_numbers = #tpu.dot_dimension_numbers<[1], [0], [0], [1], [0, 0, 1, 1], [], []>} : vector<8x8xf32>, vector<8x16xf32>, vector<8x16xf32> -> vector<8x16xf32>
    %176 = vector.extract_strided_slice %53 {offsets = [16, 0], sizes = [16, 32], strides = [1, 1]} : vector<64x32xf32> to vector<16x32xf32>
    %cst_67 = arith.constant dense<0.000000e+00> : vector<8x32xf32>
    %177 = tpu.matmul %175, %176, %cst_67 {dimension_numbers = #tpu.dot_dimension_numbers<[1], [0], [0], [1], [0, 0, 1, 1], [], []>} : vector<8x16xf32>, vector<16x32xf32>, vector<8x32xf32> -> vector<8x32xf32>
    %178 = arith.addf %160, %177 : vector<8x32xf32>
    %179 = vector.extract_strided_slice %139 {offsets = [0, 32], sizes = [8, 16], strides = [1, 1]} : vector<8x64xf32> to vector<8x16xf32>
    %180 = vector.extract_strided_slice %140 {offsets = [0, 32], sizes = [8, 16], strides = [1, 1]} : vector<8x64xf32> to vector<8x16xf32>
    %181 = vector.extract_strided_slice %141 {offsets = [0, 32], sizes = [8, 16], strides = [1, 1]} : vector<8x64xf32> to vector<8x16xf32>
    %cst_68 = arith.constant dense<0.000000e+00> : vector<8x8xf32>
    %182 = tpu.matmul %179, %180, %cst_68 {dimension_numbers = #tpu.dot_dimension_numbers<[1], [1], [0], [0], [0, 0, 1, 0], [], []>} : vector<8x16xf32>, vector<8x16xf32>, vector<8x8xf32> -> vector<8x8xf32>
    %cst_69 = arith.constant dense<0xFF800000> : vector<8xf32>
    %183 = vector.multi_reduction <maximumf>, %182, %cst_69 [1] : vector<8x8xf32> to vector<8xf32>
    %184 = vector.shape_cast %183 : vector<8xf32> to vector<8x1xf32>
    %185 = vector.broadcast %184 : vector<8x1xf32> to vector<8x8xf32>
    %186 = arith.subf %182, %185 : vector<8x8xf32>
    %187 = math.exp %186 : vector<8x8xf32>
    %cst_70 = arith.constant dense<0.000000e+00> : vector<8xf32>
    %188 = vector.multi_reduction <add>, %187, %cst_70 [1] : vector<8x8xf32> to vector<8xf32>
    %189 = vector.shape_cast %188 : vector<8xf32> to vector<8x1xf32>
    %190 = tpu.reciprocal %189 {approx = true} : vector<8x1xf32> -> vector<8x1xf32>
    %191 = vector.broadcast %190 : vector<8x1xf32> to vector<8x8xf32>
    %192 = arith.mulf %187, %191 : vector<8x8xf32>
    %cst_71 = arith.constant dense<0.000000e+00> : vector<8x16xf32>
    %193 = tpu.matmul %192, %181, %cst_71 {dimension_numbers = #tpu.dot_dimension_numbers<[1], [0], [0], [1], [0, 0, 1, 1], [], []>} : vector<8x8xf32>, vector<8x16xf32>, vector<8x16xf32> -> vector<8x16xf32>
    %194 = vector.extract_strided_slice %53 {offsets = [32, 0], sizes = [16, 32], strides = [1, 1]} : vector<64x32xf32> to vector<16x32xf32>
    %cst_72 = arith.constant dense<0.000000e+00> : vector<8x32xf32>
    %195 = tpu.matmul %193, %194, %cst_72 {dimension_numbers = #tpu.dot_dimension_numbers<[1], [0], [0], [1], [0, 0, 1, 1], [], []>} : vector<8x16xf32>, vector<16x32xf32>, vector<8x32xf32> -> vector<8x32xf32>
    %196 = arith.addf %178, %195 : vector<8x32xf32>
    %197 = vector.extract_strided_slice %139 {offsets = [0, 48], sizes = [8, 16], strides = [1, 1]} : vector<8x64xf32> to vector<8x16xf32>
    %198 = vector.extract_strided_slice %140 {offsets = [0, 48], sizes = [8, 16], strides = [1, 1]} : vector<8x64xf32> to vector<8x16xf32>
    %199 = vector.extract_strided_slice %141 {offsets = [0, 48], sizes = [8, 16], strides = [1, 1]} : vector<8x64xf32> to vector<8x16xf32>
    %cst_73 = arith.constant dense<0.000000e+00> : vector<8x8xf32>
    %200 = tpu.matmul %197, %198, %cst_73 {dimension_numbers = #tpu.dot_dimension_numbers<[1], [1], [0], [0], [0, 0, 1, 0], [], []>} : vector<8x16xf32>, vector<8x16xf32>, vector<8x8xf32> -> vector<8x8xf32>
    %cst_74 = arith.constant dense<0xFF800000> : vector<8xf32>
    %201 = vector.multi_reduction <maximumf>, %200, %cst_74 [1] : vector<8x8xf32> to vector<8xf32>
    %202 = vector.shape_cast %201 : vector<8xf32> to vector<8x1xf32>
    %203 = vector.broadcast %202 : vector<8x1xf32> to vector<8x8xf32>
    %204 = arith.subf %200, %203 : vector<8x8xf32>
    %205 = math.exp %204 : vector<8x8xf32>
    %cst_75 = arith.constant dense<0.000000e+00> : vector<8xf32>
    %206 = vector.multi_reduction <add>, %205, %cst_75 [1] : vector<8x8xf32> to vector<8xf32>
    %207 = vector.shape_cast %206 : vector<8xf32> to vector<8x1xf32>
    %208 = tpu.reciprocal %207 {approx = true} : vector<8x1xf32> -> vector<8x1xf32>
    %209 = vector.broadcast %208 : vector<8x1xf32> to vector<8x8xf32>
    %210 = arith.mulf %205, %209 : vector<8x8xf32>
    %cst_76 = arith.constant dense<0.000000e+00> : vector<8x16xf32>
    %211 = tpu.matmul %210, %199, %cst_76 {dimension_numbers = #tpu.dot_dimension_numbers<[1], [0], [0], [1], [0, 0, 1, 1], [], []>} : vector<8x8xf32>, vector<8x16xf32>, vector<8x16xf32> -> vector<8x16xf32>
    %212 = vector.extract_strided_slice %53 {offsets = [48, 0], sizes = [16, 32], strides = [1, 1]} : vector<64x32xf32> to vector<16x32xf32>
    %cst_77 = arith.constant dense<0.000000e+00> : vector<8x32xf32>
    %213 = tpu.matmul %211, %212, %cst_77 {dimension_numbers = #tpu.dot_dimension_numbers<[1], [0], [0], [1], [0, 0, 1, 1], [], []>} : vector<8x16xf32>, vector<16x32xf32>, vector<8x32xf32> -> vector<8x32xf32>
    %214 = arith.addf %196, %213 : vector<8x32xf32>
    %215 = vector.broadcast %59 : vector<1x32xf32> to vector<8x32xf32>
    %216 = arith.addf %214, %215 : vector<8x32xf32>
    %c8 = arith.constant 8 : index
    %c0_78 = arith.constant 0 : index
    %217 = vector.load %arg16[%c8, %c0_78] : memref<16x32xf32, #tpu.memory_space<vmem>>, vector<8x32xf32>
    tpu.vector_store %arg16[%c8, %c0_78], %216 {strides = array<i32>} : memref<16x32xf32, #tpu.memory_space<vmem>>, vector<8x32xf32>,
    %c0_79 = arith.constant 0 : index
    %c0_80 = arith.constant 0 : index
    %218 = vector.load %arg16[%c0_79, %c0_80] : memref<16x32xf32, #tpu.memory_space<vmem>>, vector<16x32xf32>
    %219 = arith.addf %0, %218 : vector<16x32xf32>
    %cst_81 = arith.constant dense<0.000000e+00> : vector<16xf32>
    %220 = vector.multi_reduction <add>, %219, %cst_81 [1] : vector<16x32xf32> to vector<16xf32>
    %221 = vector.shape_cast %220 : vector<16xf32> to vector<16x1xf32>
    %cst_82 = arith.constant 3.200000e+01 : f32
    %222 = vector.broadcast %cst_82 : f32 to vector<16x1xf32>
    %223 = arith.divf %221, %222 : vector<16x1xf32>
    %224 = vector.broadcast %223 : vector<16x1xf32> to vector<16x32xf32>
    %225 = arith.subf %219, %224 : vector<16x32xf32>
    %226 = arith.mulf %225, %225 : vector<16x32xf32>
    %cst_83 = arith.constant dense<0.000000e+00> : vector<16xf32>
    %227 = vector.multi_reduction <add>, %226, %cst_83 [1] : vector<16x32xf32> to vector<16xf32>
    %228 = vector.shape_cast %227 : vector<16xf32> to vector<16x1xf32>
    %cst_84 = arith.constant 3.200000e+01 : f32
    %229 = vector.broadcast %cst_84 : f32 to vector<16x1xf32>
    %230 = arith.divf %228, %229 : vector<16x1xf32>
    %231 = vector.broadcast %223 : vector<16x1xf32> to vector<16x32xf32>
    %232 = arith.subf %219, %231 : vector<16x32xf32>
    %cst_85 = arith.constant 9.99999974E-6 : f32
    %233 = vector.broadcast %cst_85 : f32 to vector<16x1xf32>
    %234 = arith.addf %230, %233 : vector<16x1xf32>
    %235 = math.rsqrt %234 : vector<16x1xf32>
    %236 = vector.broadcast %235 : vector<16x1xf32> to vector<16x32xf32>
    %237 = arith.mulf %232, %236 : vector<16x32xf32>
    %c0_86 = arith.constant 0 : index
    %c0_87 = arith.constant 0 : index
    %238 = vector.load %arg9[%c0_86, %c0_87] : memref<1x32xf32, #tpu.memory_space<vmem>>, vector<1x32xf32>
    %239 = vector.broadcast %238 : vector<1x32xf32> to vector<16x32xf32>
    %240 = arith.mulf %237, %239 : vector<16x32xf32>
    %c0_88 = arith.constant 0 : index
    %c0_89 = arith.constant 0 : index
    %241 = vector.load %arg10[%c0_88, %c0_89] : memref<1x32xf32, #tpu.memory_space<vmem>>, vector<1x32xf32>
    %242 = vector.broadcast %241 : vector<1x32xf32> to vector<16x32xf32>
    %243 = arith.addf %240, %242 : vector<16x32xf32>
    %c0_90 = arith.constant 0 : index
    %c0_91 = arith.constant 0 : index
    %244 = vector.load %arg11[%c0_90, %c0_91] : memref<32x64xf32, #tpu.memory_space<vmem>>, vector<32x64xf32>
    %cst_92 = arith.constant dense<0.000000e+00> : vector<16x64xf32>
    %245 = tpu.matmul %243, %244, %cst_92 {dimension_numbers = #tpu.dot_dimension_numbers<[1], [0], [0], [1], [0, 0, 1, 1], [], []>} : vector<16x32xf32>, vector<32x64xf32>, vector<16x64xf32> -> vector<16x64xf32>
    %c0_93 = arith.constant 0 : index
    %c0_94 = arith.constant 0 : index
    %246 = vector.load %arg12[%c0_93, %c0_94] : memref<1x64xf32, #tpu.memory_space<vmem>>, vector<1x64xf32>
    %247 = vector.broadcast %246 : vector<1x64xf32> to vector<16x64xf32>
    %248 = arith.addf %245, %247 : vector<16x64xf32>
    %cst_95 = arith.constant 5.000000e-01 : f32
    %249 = vector.broadcast %cst_95 : f32 to vector<16x64xf32>
    %250 = arith.mulf %249, %248 : vector<16x64xf32>
    %cst_96 = arith.constant 4.471500e-02 : f32
    %251 = vector.broadcast %cst_96 : f32 to vector<16x64xf32>
    %252 = arith.mulf %251, %248 : vector<16x64xf32>
    %253 = arith.mulf %252, %248 : vector<16x64xf32>
    %254 = arith.mulf %253, %248 : vector<16x64xf32>
    %255 = arith.addf %248, %254 : vector<16x64xf32>
    %cst_97 = arith.constant 0.797884583 : f32
    %256 = vector.broadcast %cst_97 : f32 to vector<16x64xf32>
    %257 = arith.mulf %256, %255 : vector<16x64xf32>
    %258 = math.tanh %257 : vector<16x64xf32>
    %cst_98 = arith.constant 1.000000e+00 : f32
    %259 = vector.broadcast %cst_98 : f32 to vector<16x64xf32>
    %260 = arith.addf %259, %258 : vector<16x64xf32>
    %261 = arith.mulf %250, %260 : vector<16x64xf32>
    %c0_99 = arith.constant 0 : index
    %c0_100 = arith.constant 0 : index
    %262 = vector.load %arg13[%c0_99, %c0_100] : memref<64x32xf32, #tpu.memory_space<vmem>>, vector<64x32xf32>
    %cst_101 = arith.constant dense<0.000000e+00> : vector<16x32xf32>
    %263 = tpu.matmul %261, %262, %cst_101 {dimension_numbers = #tpu.dot_dimension_numbers<[1], [0], [0], [1], [0, 0, 1, 1], [], []>} : vector<16x64xf32>, vector<64x32xf32>, vector<16x32xf32> -> vector<16x32xf32>
    %c0_102 = arith.constant 0 : index
    %c0_103 = arith.constant 0 : index
    %264 = vector.load %arg14[%c0_102, %c0_103] : memref<1x32xf32, #tpu.memory_space<vmem>>, vector<1x32xf32>
    %265 = vector.broadcast %264 : vector<1x32xf32> to vector<16x32xf32>
    %266 = arith.addf %263, %265 : vector<16x32xf32>
    %267 = arith.addf %219, %266 : vector<16x32xf32>
    %c0_104 = arith.constant 0 : index
    %c0_105 = arith.constant 0 : index
    %268 = vector.load %arg15[%c0_104, %c0_105] : memref<16x32xf32, #tpu.memory_space<vmem>>, vector<16x32xf32>
    tpu.vector_store %arg15[%c0_104, %c0_105], %267 {strides = array<i32>} : memref<16x32xf32, #tpu.memory_space<vmem>>, vector<16x32xf32>,
    return
  }
}

</mosaic_0001>

<bundles_post_ra>
// kernel: tpu_custom_call.1
= control target key start
LH: loop header
LB: loop body
LE: loop exit
PB: predicated region body
PF: predicated region fallthrough
CT: control target
= control target key end

     0   :  { %20 = vsyncpa [#allocation4], 0  ;;  %s1750_s0 = inlined_call_operand.vmem [shape: f32[16,32], index: 0, kind: input, shape index: {}]   ;;  %s1751_s1 = inlined_call_operand.vmem [shape: f32[16,32], index: 1, kind: input, shape index: {}]   ;;  %s1752_s2 = inlined_call_operand.hbm [shape: f32[1,32], index: 2, kind: input, shape index: {}]   ;;  %s1753_s3 = inlined_call_operand.vmem [shape: f32[1,32], index: 3, kind: input, shape index: {}]   ;;  %s1754_s4 = inlined_call_operand.vmem [shape: f32[32,64], index: 4, kind: input, shape index: {}]   ;;  %s1755_s5 = inlined_call_operand.vmem [shape: f32[32,64], index: 5, kind: input, shape index: {}]   ;;  %s1756_s6 = inlined_call_operand.vmem [shape: f32[32,64], index: 6, kind: input, shape index: {}]   ;;  %s1757_s7 = inlined_call_operand.vmem [shape: f32[64,32], index: 7, kind: input, shape index: {}]   ;;  %s1758_s8 = inlined_call_operand.vmem [shape: f32[1,32], index: 8, kind: input, shape index: {}]   ;;  %s1759_s9 = inlined_call_operand.vmem [shape: f32[1,32], index: 9, kind: input, shape index: {}]   ;;  %s1760_s10 = inlined_call_operand.vmem [shape: f32[1,32], index: 10, kind: input, shape index: {}]   ;;  %s1761_s11 = inlined_call_operand.vmem [shape: f32[32,64], index: 11, kind: input, shape index: {}]   ;;  %s1762_s12 = inlined_call_operand.vmem [shape: f32[1,64], index: 12, kind: input, shape index: {}]   ;;  %s1763_s13 = inlined_call_operand.vmem [shape: f32[64,32], index: 13, kind: input, shape index: {}]   ;;  %s1764_s14 = inlined_call_operand.vmem [shape: f32[1,32], index: 14, kind: input, shape index: {}]   ;;  %s1765_s15 = inlined_call_operand.hbm [shape: f32[16,32], index: 15, kind: output, shape index: {}]  }
   0x1   :  { %21 = vsyncpa [#allocation5], 0  ;;  %s31_s20 = sshll.u32 %s1752_s2, 4  ;;  %s1337_s21 = smov [#allocation3]   ;;  %s32_s20 = int_to_ptr.hbm [resolvable:$true] %s31_s20 }
   0x2   :  { %s33_s22 = sshll.u32 %s1337_s21, 4  ;;  %s34_s22 = int_to_ptr.vmem [resolvable:$true] %s33_s22 }
   0x3   :  { %36 = dma.hbm_to_vmem [thread:$0]  %s32_s20, 16, %s34_s22, [#allocation4]  }
   0x4   :  { %1333 = dma.done.wait [#allocation4], 16  }
   0x5   :  { %1334 = vsyncadd [#allocation4], 4294967280  ;;  %vm69_vm0 = vcmask 261120   ;;  %v68_v0 = vld [vmem:[%s1751_s1 + $0x8] sm:$0xff]  ;;  %v67_v1 = vld [vmem:[%s1751_s1] sm:$0xff]  ;;  %v1338_v6 = vmov 32.0  }
   0x6   :  { %v136_v2 = vsel %vm69_vm0, %v68_v0, 0.0  ;;  %v133_v3 = vsel %vm69_vm0, %v67_v1, 0.0  ;;  %v1439_v4 = vld [vmem:[%s1750_s0] sm:$0xff]  ;;  %1235 = vrcp.f32 %v1338_v6  ;;  %v188_v28 = vld [vmem:[%s1755_s5 + $0x18] sm:$0xff]  ;;  %v187_v30 = vld [vmem:[%s1755_s5 + $0x10] sm:$0xff]  ;;  %vm285_vm11 = vcmask 130048  }
   0x7   :  { %137 = vadd.xlane.f32.xlu2 %v136_v2  ;;  %134 = vadd.xlane.f32.xlu0 %v133_v3  ;;  %v70_v5 = vsel %vm69_vm0, %v1439_v4, 0.0  ;;  %v192_v29 = vld [vmem:[%s1756_s6 + $0x18] sm:$0xff]  ;;  %v191_v31 = vld [vmem:[%s1756_s6 + $0x10] sm:$0xff]  ;;  %v186_v32 = vld [vmem:[%s1755_s5 + $0x8] sm:$0xff]  ;;  %s1340_s18 = smov 96   ;;  %vm312_vm12 = vcmask 64512  }
   0x8   :  { %250 = vmatpush.msra.mxu1 %v188_v28  ;;  %273 = vmatpush.msra.mxu2 %v192_v29  ;;  %v190_v33 = vld [vmem:[%s1756_s6 + $0x8] sm:$0xff]  ;;  %v185_v34 = vld [vmem:[%s1755_s5] sm:$0xff]  ;;  %v184_v36 = vld [vmem:[%s1754_s4 + $0x18] sm:$0xff]  ;;  %s1161_s21 = sshll.u32 %s1765_s15, 4  ;;  %s1343_s22 = smov 128   ;;  %s1162_s21 = int_to_ptr.hbm [resolvable:$true] %s1161_s21 }
   0x9   :  { %1216 = vmatpush.msra.mxu3 %v192_v29  ;;  %v189_v35 = vld [vmem:[%s1756_s6] sm:$0xff]  ;;  %v183_v37 = vld [vmem:[%s1754_s4 + $0x10] sm:$0xff]  ;;  %219 = vmatpush.msra.mxu0 %v184_v36  ;;  %v182_v40 = vld [vmem:[%s1754_s4 + $0x8] sm:$0xff]  ;;  %s1344_s23 = smov 8  }
   0xa   :  { %251 = vmatpush.msra.mxu1 %v187_v30  ;;  %274 = vmatpush.msra.mxu2 %v191_v31  ;;  %v181_v43 = vld [vmem:[%s1754_s4] sm:$0xff]  ;;  %v1503_v63 = vld [vmem:[#allocation3] ss:$0 sm:$0xff] }
   0xb   :  { %1217 = vmatpush.msra.mxu3 %v191_v31  ;;  %220 = vmatpush.msra.mxu0 %v183_v37  ;;  %v1508_v3 = vld [vmem:[%s1753_s3] ss:$0 sm:$0xff]  ;;  %s1339_s3 = smov 112  }
   0xc   :  { %v1236_v7 = vpop.eup %1235  ;;  %252 = vmatpush.msra.mxu1 %v186_v32  ;;  %275 = vmatpush.msra.mxu2 %v190_v33 }
   0xd   :  { %v77_v8 = vmul.f32 32.0, %v1236_v7  ;;  %vm81_vm1 = vweird.f32 %v1236_v7  ;;  %1218 = vmatpush.msra.mxu3 %v190_v33  ;;  %221 = vmatpush.msra.mxu0 %v182_v40 }
   0xe   :  { %253 = vmatpush.msra.mxu1 %v185_v34  ;;  %276 = vmatpush.msra.mxu2 %v189_v35 }
   0xf   :  { %71 = vadd.xlane.f32.xlu0 %v70_v5  ;;  %v78_v9 = vsub.f32 1.0, %v77_v8  ;;  %1219 = vmatpush.msra.mxu3 %v189_v35 }
  0x10   :  { %222 = vmatpush.msra.mxu0 %v181_v43 }
  0x11   :  { %v79_v10 = vmul.f32 %v1236_v7, %v78_v9 }
  0x13   :  { %v80_v11 = vadd.f32 %v1236_v7, %v79_v10 }
  0x15   :  { %v1443_v12 = vsel %vm81_vm1, %v1236_v7, %v80_v11 }
  0x7a   :  { %v138_v13 = vpop.xlane.xlu2 %137  ;;  %v135_v14 = vpop.xlane.xlu0 %134 }
  0x7b   :  { %v140_v15 = vmul.f32 %v138_v13, %v1443_v12  ;;  %v139_v16 = vmul.f32 %v135_v14, %v1443_v12 }
  0x7d   :  { %v1447_v17 = vsub.f32 %v68_v0, %v140_v15  ;;  %v1449_v18 = vsub.f32 %v67_v1, %v139_v16 }
  0x7f   :  { %v144_v19 = vmul.f32 %v1447_v17, %v1447_v17  ;;  %v143_v20 = vmul.f32 %v1449_v18, %v1449_v18 }
  0x81   :  { %v148_v21 = vsel %vm69_vm0, %v144_v19, 0.0  ;;  %v145_v22 = vsel %vm69_vm0, %v143_v20, 0.0 }
  0x82   :  { %149 = vadd.xlane.f32.xlu2 %v148_v21  ;;  %146 = vadd.xlane.f32.xlu1 %v145_v22  ;;  %v72_v23 = vpop.xlane.xlu0 %71 }
  0x83   :  { %v83_v24 = vmul.f32 %v1443_v12, %v72_v23 }
  0x85   :  { %v1459_v25 = vsub.f32 %v1439_v4, %v83_v24 }
  0x87   :  { %v87_v26 = vmul.f32 %v1459_v25, %v1459_v25 }
  0x89   :  { %v89_v27 = vsel %vm69_vm0, %v87_v26, 0.0 }
  0x8a   :  { %90 = vadd.xlane.f32.xlu1 %v89_v27  ;;  %v1543_v27 = vld [vmem:[%s1750_s0 + $0x8] sm:$0xff]  ;;  %s1341_s0 = smov 80  }
  0x8b   :  { %v73_v28 = vsel %vm69_vm0, %v1543_v27, 0.0 }
  0xf5   :  { %v150_v38 = vpop.xlane.xlu2 %149  ;;  %v147_v39 = vpop.xlane.xlu1 %146 }
  0xf6   :  { %v152_v41 = vmul.f32 %v150_v38, %v1443_v12  ;;  %v151_v42 = vmul.f32 %v147_v39, %v1443_v12 }
  0xf8   :  { %v154_v44 = vadd.f32 1e-05, %v152_v41  ;;  %v153_v45 = vadd.f32 1e-05, %v151_v42 }
  0xfa   :  { %1237 = vrsqrt.f32 %v154_v44  ;;  %vm171_vm2 = vweird.f32 %v154_v44  ;;  %vm161_vm6 = vweird.f32 %v153_v45 }
  0xfb   :  { %1239 = vrsqrt.f32 %v153_v45 }
  0xfd   :  { %v91_v46 = vpop.xlane.xlu1 %90 }
  0xfe   :  { %v95_v47 = vmul.f32 %v91_v46, %v1443_v12 }
 0x100   :  { %v1238_v48 = vpop.eup %1237  ;;  %v97_v49 = vadd.f32 1e-05, %v95_v47 }
 0x101   :  { %v1240_v50 = vpop.eup %1239  ;;  %v166_v51 = vmul.f32 %v1238_v48, %v154_v44  ;;  %vm172_vm3 = vweird.f32 %v1238_v48 }
 0x102   :  { %v156_v52 = vmul.f32 %v1240_v50, %v153_v45  ;;  %1241 = vrsqrt.f32 %v97_v49  ;;  %vm173_vm4 = vmor %vm171_vm2, %vm172_vm3  ;;  %vm162_vm5 = vweird.f32 %v1240_v50  ;;  %vm105_vm9 = vweird.f32 %v97_v49  ;;  %v1563_v45 = vld [vmem:[%s1757_s7 + $0x8] sm:$0xff] }
 0x103   :  { %v167_v53 = vmul.f32 %v1238_v48, %v166_v51  ;;  %vm163_vm7 = vmor %vm161_vm6, %vm162_vm5  ;;  %453 = vmatpush.msrb.mxu2 %v1563_v45 }
 0x104   :  { %v157_v54 = vmul.f32 %v1240_v50, %v156_v52  ;;  %v193_v52 = vld [vmem:[%s1757_s7] sm:$0xff] }
 0x105   :  { %v168_v55 = vmul.f32 0.5, %v167_v53  ;;  %454 = vmatpush.msrb.mxu2 %v193_v52 }
 0x106   :  { %v158_v56 = vmul.f32 0.5, %v157_v54 }
 0x107   :  { %v169_v57 = vsub.f32 1.5, %v168_v55 }
 0x108   :  { %v1242_v58 = vpop.eup %1241  ;;  %v159_v59 = vsub.f32 1.5, %v158_v56 }
 0x109   :  { %v170_v60 = vmul.f32 %v1238_v48, %v169_v57  ;;  %v100_v61 = vmul.f32 %v1242_v58, %v97_v49  ;;  %vm106_vm8 = vweird.f32 %v1242_v58 }
 0x10a   :  { %v160_v62 = vmul.f32 %v1240_v50, %v159_v59  ;;  %vm107_vm10 = vmor %vm105_vm9, %vm106_vm8 }
 0x10b   :  { %v174_v0 = vsel %vm173_vm4, %v1238_v48, %v170_v60  ;;  %v101_v1 = vmul.f32 %v1242_v58, %v100_v61  ;;  %vm1121_vm4 = vcmask 523264  }
 0x10c   :  { %v164_v2 = vsel %vm163_vm7, %v1240_v50, %v160_v62  ;;  %v176_v5 = vmul.f32 %v174_v0, %v1447_v17 }
 0x10d   :  { %v102_v6 = vmul.f32 0.5, %v101_v1  ;;  %v175_v7 = vmul.f32 %v164_v2, %v1449_v18 }
 0x10e   :  { %v178_v8 = vmul.f32 %v1503_v63, %v176_v5 }
 0x10f   :  { %v103_v9 = vsub.f32 1.5, %v102_v6  ;;  %v177_v10 = vmul.f32 %v1503_v63, %v175_v7 }
 0x110   :  { %v180_v11 = vadd.f32 %v1508_v3, %v178_v8 }
 0x111   :  { %v104_v13 = vmul.f32 %v1242_v58, %v103_v9  ;;  %v179_v14 = vadd.f32 %v1508_v3, %v177_v10 }
 0x112   :  { %1179 = vmatmul.msk.f32.vlgmr.msra.gmra.mxu3 %vm69_vm0, %v180_v11 }
 0x113   :  { %v108_v15 = vsel %vm107_vm10, %v1242_v58, %v104_v13  ;;  %1176 = vmatmul.msk.f32.vlgmr.msra.gmra.mxu1 %vm69_vm0, %v179_v14  ;;  %1178 = vmatmul.msk.f32.vlgmr.msra.gmra.mxu2 %vm69_vm0, %v179_v14 }
 0x114   :  { %v119_v16 = vmul.f32 %v108_v15, %v1459_v25  ;;  %v196_v15 = vld [vmem:[%s1757_s7 + $0x18] sm:$0xff] }
 0x115   :  { %430 = vmatpush.msrb.mxu1 %v196_v15 }
 0x116   :  { %v125_v17 = vmul.f32 %v1503_v63, %v119_v16  ;;  %v195_v16 = vld [vmem:[%s1757_s7 + $0x10] sm:$0xff] }
 0x117   :  { %431 = vmatpush.msrb.mxu1 %v195_v16 }
 0x118   :  { %v131_v18 = vadd.f32 %v1508_v3, %v125_v17 }
 0x11a   :  { %1174 = vmatmul.msk.f32.vlgmr.msra.gmra.mxu0 %vm69_vm0, %v131_v18  ;;  %v198_v18 = vld [vmem:[%s1757_s7 + $0x28] sm:$0xff] }
 0x11b   :  { %1177 = vmatmul.msk.f32.gmra.mxu1 %vm69_vm0, %v180_v11 }
 0x11c   :  { %541 = vmatpush.msra.mxu1 %v198_v18 }
 0x190   :  { %v1524_v19 = vpop.f32.mrf.mxu1 }
 0x191   :  { %349 = vrot.lane.b32.xlu2 %v1524_v19, %s1339_s3  ;;  %1180 = vmatpush.xpose.msk.msrb.mxu3 %vm285_vm11, %v1524_v19 }
 0x195   :  { %v1536_v24 = vpop.f32.mrf.mxu3 }
 0x196   :  { %v1530_v20 = vpop.f32.mrf.mxu2 }
 0x197   :  { %342 = vmatpush.msra.mxu3 %v1530_v20  ;;  %v224_v21 = vpop.f32.mrf.mxu0 }
 0x198   :  { %v230_v22 = vmul.f32 0.17677669, %v224_v21 }
 0x19a   :  { %459 = vrot.lane.b32.xlu2 %v230_v22, %s1340_s18  ;;  %1181 = vmatmul.msk.f32.vlgmr.msrb.gmra.mxu3 %vm285_vm11, %v230_v22 }
 0x1eb   :  { %v350_v23 = vpop.permute.xlu2 %349 }
 0x1ec   :  { %1183 = vmatpush.xpose.msk.msrb.mxu3 %vm285_vm11, %v350_v23 }
 0x1f4   :  { %v460_v44 = vpop.permute.xlu2 %459 }
 0x21d   :  { %v309_v25 = vpop.f32.mrf.mxu3 }
 0x21e   :  { %v313_v26 = vsel %vm312_vm12, %v309_v25, -inf }
 0x21f   :  { %314 = vmax.xlane.f32.xlu0 %v313_v26 }
 0x233   :  { %347 = vrot.lane.b32.xlu0 %v230_v22, %s1339_s3 }
 0x25d   :  { %74 = vadd.xlane.f32.xlu0 %v73_v28 }
 0x292   :  { %v315_v29 = vpop.xlane.xlu0 %314 }
 0x293   :  { %v316_v30 = vsub.f32 %v309_v25, %v315_v29  ;;  %v197_v29 = vld [vmem:[%s1757_s7 + $0x20] sm:$0xff] }
 0x294   :  { %542 = vmatpush.msra.mxu1 %v197_v29 }
 0x295   :  { %v317_v31 = vmul.f32 1.442695, %v316_v30 }
 0x297   :  { %1243 = vpow2.f32 %v317_v31 }
 0x29d   :  { %v1244_v32 = vpop.eup %1243 }
 0x29e   :  { %v319_v33 = vsel %vm312_vm12, %v1244_v32, 0.0 }
 0x29f   :  { %320 = vadd.xlane.f32.xlu1 %v319_v33 }
 0x2a5   :  { %v348_v34 = vpop.permute.xlu0 %347 }
 0x2b8   :  { %461 = vrot.lane.b32.xlu1 %v1524_v19, %s1340_s18 }
 0x2d0   :  { %v75_v35 = vpop.xlane.xlu0 %74 }
 0x2d1   :  { %v84_v36 = vmul.f32 %v1443_v12, %v75_v35 }
 0x2d3   :  { %v86_v37 = vsub.f32 %v1543_v27, %v84_v36 }
 0x2d5   :  { %v88_v38 = vmul.f32 %v86_v37, %v86_v37 }
 0x2d7   :  { %v92_v39 = vsel %vm69_vm0, %v88_v38, 0.0 }
 0x2d8   :  { %93 = vadd.xlane.f32.xlu0 %v92_v39 }
 0x2ec   :  { %387 = vrot.lane.b32.xlu0 %v1530_v20, %s1339_s3 }
 0x2f4   :  { %548 = vrot.lane.b32.xlu0 %v230_v22, %s1341_s0 }
 0x312   :  { %v321_v40 = vpop.xlane.xlu1 %320 }
 0x313   :  { %1245 = vrcp.f32 %v321_v40 }
 0x319   :  { %v1246_v41 = vpop.eup %1245 }
 0x31a   :  { %v323_v42 = vmul.f32 %v1246_v41, %v1244_v32  ;;  %v258_v32 = vpop.f32.mrf.mxu1 }
 0x31c   :  { %1182 = vmatmul.msk.f32.vlgmr.msra.gmra.mxu3 %vm312_vm12, %v323_v42 }
 0x324   :  { %1184 = vmatmul.msk.f32.vlgmr.msrb.gmra.mxu3 %vm285_vm11, %v348_v34 }
 0x32a   :  { %v462_v43 = vpop.permute.xlu1 %461 }
 0x32b   :  { %1188 = vmatpush.xpose.msk.msra.mxu3 %vm285_vm11, %v462_v43 }
 0x32e   :  { %1189 = vmatmul.msk.f32.vlgmr.msra.gmra.mxu3 %vm285_vm11, %v460_v44 }
 0x34b   :  { %v94_v46 = vpop.xlane.xlu0 %93 }
 0x34c   :  { %v96_v48 = vmul.f32 %v94_v46, %v1443_v12 }
 0x34e   :  { %v98_v49 = vadd.f32 1e-05, %v96_v48 }
 0x350   :  { %1247 = vrsqrt.f32 %v98_v49  ;;  %vm115_vm13 = vweird.f32 %v98_v49 }
 0x356   :  { %v1248_v50 = vpop.eup %1247 }
 0x357   :  { %v110_v51 = vmul.f32 %v1248_v50, %v98_v49  ;;  %vm116_vm14 = vweird.f32 %v1248_v50 }
 0x358   :  { %vm117_vm15 = vmor %vm115_vm13, %vm116_vm14 }
 0x359   :  { %v111_v53 = vmul.f32 %v1248_v50, %v110_v51 }
 0x35b   :  { %v112_v54 = vmul.f32 0.5, %v111_v53 }
 0x35d   :  { %v113_v55 = vsub.f32 1.5, %v112_v54 }
 0x35e   :  { %v388_v47 = vpop.permute.xlu0 %387 }
 0x35f   :  { %408 = vmatpush.msrb.mxu0 %v388_v47  ;;  %v114_v56 = vmul.f32 %v1248_v50, %v113_v55 }
 0x361   :  { %v118_v57 = vsel %vm117_vm15, %v1248_v50, %v114_v56 }
 0x362   :  { %v120_v58 = vmul.f32 %v118_v57, %v86_v37 }
 0x364   :  { %v126_v59 = vmul.f32 %v1503_v63, %v120_v58 }
 0x366   :  { %v132_v60 = vadd.f32 %v1508_v3, %v126_v59  ;;  %v549_v28 = vpop.permute.xlu0 %548 }
 0x368   :  { %1175 = vmatmul.msk.f32.gmra.mxu0 %vm69_vm0, %v132_v60 }
 0x39f   :  { %v344_v61 = vpop.f32.mrf.mxu3 }
 0x3a0   :  { %1187 = vmatmul.msk.f32.vlgmr.msrb.gmra.mxu2 %vm285_vm11, %v344_v61 }
 0x3a7   :  { %v372_v62 = vpop.f32.mrf.mxu3 }
 0x3a8   :  { %v375_v0 = vsel %vm312_vm12, %v372_v62, -inf }
 0x3a9   :  { %376 = vmax.xlane.f32.xlu2 %v375_v0 }
 0x3b1   :  { %v484_v1 = vpop.f32.mrf.mxu3 }
 0x3b2   :  { %v487_v2 = vsel %vm312_vm12, %v484_v1, -inf }
 0x3b3   :  { %488 = vmax.xlane.f32.xlu1 %v487_v2  ;;  %v200_v2 = vld [vmem:[%s1757_s7 + $0x38] sm:$0xff] }
 0x3e5   :  { %v227_v30 = vpop.f32.mrf.mxu0 }
 0x3e6   :  { %v231_v34 = vmul.f32 0.17677669, %v227_v30 }
 0x41c   :  { %v377_v5 = vpop.xlane.xlu2 %376 }
 0x41d   :  { %v378_v6 = vsub.f32 %v372_v62, %v377_v5  ;;  %v199_v5 = vld [vmem:[%s1757_s7 + $0x30] sm:$0xff] }
 0x41f   :  { %v379_v7 = vmul.f32 1.442695, %v378_v6 }
 0x421   :  { %1249 = vpow2.f32 %v379_v7 }
 0x423   :  { %v456_v35 = vpop.f32.mrf.mxu2 }
 0x426   :  { %v489_v63 = vpop.xlane.xlu1 %488 }
 0x427   :  { %v1250_v8 = vpop.eup %1249  ;;  %v490_v3 = vsub.f32 %v484_v1, %v489_v63 }
 0x428   :  { %v381_v9 = vsel %vm312_vm12, %v1250_v8, 0.0 }
 0x429   :  { %v491_v10 = vmul.f32 1.442695, %v490_v3  ;;  %382 = vadd.xlane.f32.xlu2 %v381_v9 }
 0x42b   :  { %1251 = vpow2.f32 %v491_v10 }
 0x431   :  { %v1252_v11 = vpop.eup %1251 }
 0x432   :  { %v493_v13 = vsel %vm312_vm12, %v1252_v11, 0.0 }
 0x433   :  { %494 = vadd.xlane.f32.xlu1 %v493_v13 }
 0x441   :  { %498 = vrot.lane.b32.xlu2 %v1530_v20, %s1340_s18 }
 0x44c   :  { %550 = vrot.lane.b32.xlu1 %v1524_v19, %s1341_s0 }
 0x49c   :  { %v383_v14 = vpop.xlane.xlu2 %382 }
 0x49d   :  { %1253 = vrcp.f32 %v383_v14  ;;  %v1641_v14 = vld [vmem:[%s1758_s8] ss:$0 sm:$0xff] }
 0x4a3   :  { %v1254_v17 = vpop.eup %1253 }
 0x4a4   :  { %v499_v21 = vpop.permute.xlu2 %498  ;;  %v385_v22 = vmul.f32 %v1254_v17, %v1250_v8 }
 0x4a5   :  { %519 = vmatpush.msra.mxu0 %v499_v21 }
 0x4a6   :  { %v495_v19 = vpop.xlane.xlu1 %494  ;;  %1185 = vmatmul.msk.f32.vlgmr.msrb.gmra.mxu0 %vm312_vm12, %v385_v22 }
 0x4a7   :  { %1255 = vrcp.f32 %v495_v19  ;;  %630 = vmatpush.msrb.mxu0 %v200_v2 }
 0x4a9   :  { %631 = vmatpush.msrb.mxu0 %v199_v5 }
 0x4ad   :  { %v1256_v23 = vpop.eup %1255 }
 0x4ae   :  { %v497_v25 = vmul.f32 %v1256_v23, %v1252_v11 }
 0x4b0   :  { %1190 = vmatmul.msk.f32.vlgmr.msra.gmra.mxu0 %vm312_vm12, %v497_v25 }
 0x4be   :  { %v551_v26 = vpop.permute.xlu1 %550 }
 0x4bf   :  { %1192 = vmatpush.xpose.msk.msra.mxu2 %vm285_vm11, %v551_v26 }
 0x4c2   :  { %1193 = vmatmul.msk.f32.vlgmr.msra.gmra.mxu2 %vm285_vm11, %v549_v28 }
 0x4c3   :  { %697 = vmatpush.msrb.mxu2 %v1536_v24 }
 0x4c5   :  { %808 = vmatpush.msra.mxu2 %v1563_v45 }
 0x4c7   :  { %809 = vmatpush.msra.mxu2 %v193_v52 }
 0x523   :  { %v410_v31 = vpop.f32.mrf.mxu0 }
 0x524   :  { %1186 = vmatmul.msk.f32.vlgmr.msrb.gmra.mxu1 %vm285_vm11, %v410_v31 }
 0x525   :  { %1196 = vmatpush.xpose.msk.msrb.mxu1 %vm285_vm11, %v258_v32 }
 0x52d   :  { %v521_v33 = vpop.f32.mrf.mxu0 }
 0x52e   :  { %1191 = vmatmul.msk.f32.vlgmr.msra.gmra.mxu1 %vm285_vm11, %v521_v33 }
 0x52f   :  { %785 = vmatpush.msra.mxu1 %v196_v15 }
 0x531   :  { %786 = vmatpush.msra.mxu1 %v195_v16 }
 0x536   :  { %1197 = vmatmul.msk.f32.vlgmr.msrb.gmra.mxu1 %vm285_vm11, %v231_v34 }
 0x537   :  { %896 = vmatpush.msrb.mxu1 %v198_v18 }
 0x539   :  { %897 = vmatpush.msrb.mxu1 %v197_v29 }
 0x545   :  { %v573_v36 = vpop.f32.mrf.mxu2 }
 0x546   :  { %v576_v37 = vsel %vm312_vm12, %v573_v36, -inf }
 0x547   :  { %577 = vmax.xlane.f32.xlu1 %v576_v37 }
 0x560   :  { %704 = vrot.lane.b32.xlu1 %v258_v32, %s1339_s3 }
 0x568   :  { %903 = vrot.lane.b32.xlu1 %v231_v34, %s1341_s0 }
 0x5a1   :  { %v433_v38 = vpop.f32.mrf.mxu1 }
 0x5a2   :  { %v457_v39 = vadd.f32 %v456_v35, %v433_v38 }
 0x5ab   :  { %v544_v40 = vpop.f32.mrf.mxu1 }
 0x5ac   :  { %v1607_v41 = vadd.f32 %v544_v40, %v457_v39 }
 0x5b3   :  { %v665_v42 = vpop.f32.mrf.mxu1 }
 0x5b4   :  { %v668_v43 = vsel %vm312_vm12, %v665_v42, -inf }
 0x5b5   :  { %669 = vmax.xlane.f32.xlu2 %v668_v43 }
 0x5ba   :  { %v578_v44 = vpop.xlane.xlu1 %577 }
 0x5bb   :  { %v579_v45 = vsub.f32 %v573_v36, %v578_v44 }
 0x5bd   :  { %v580_v46 = vmul.f32 1.442695, %v579_v45 }
 0x5bf   :  { %1257 = vpow2.f32 %v580_v46 }
 0x5c5   :  { %v1258_v47 = vpop.eup %1257 }
 0x5c6   :  { %v582_v48 = vsel %vm312_vm12, %v1258_v47, 0.0 }
 0x5c7   :  { %583 = vadd.xlane.f32.xlu2 %v582_v48 }
 0x5d2   :  { %v705_v61 = vpop.permute.xlu1 %704 }
 0x5da   :  { %v904_v7 = vpop.permute.xlu1 %903 }
 0x5df   :  { %702 = vrot.lane.b32.xlu2 %v231_v34, %s1339_s3 }
 0x5e7   :  { %814 = vrot.lane.b32.xlu2 %v231_v34, %s1340_s18 }
 0x628   :  { %v670_v49 = vpop.xlane.xlu2 %669 }
 0x629   :  { %v671_v50 = vsub.f32 %v665_v42, %v670_v49 }
 0x62b   :  { %v672_v51 = vmul.f32 1.442695, %v671_v50 }
 0x62d   :  { %1259 = vpow2.f32 %v672_v51 }
 0x633   :  { %v1260_v52 = vpop.eup %1259 }
 0x634   :  { %v674_v53 = vsel %vm312_vm12, %v1260_v52, 0.0 }
 0x635   :  { %675 = vadd.xlane.f32.xlu0 %v674_v53 }
 0x63a   :  { %v584_v56 = vpop.xlane.xlu2 %583 }
 0x642   :  { %v703_v62 = vpop.permute.xlu2 %702 }
 0x649   :  { %587 = vrot.lane.b32.xlu0 %v1530_v20, %s1341_s0 }
 0x64a   :  { %v815_v1 = vpop.permute.xlu2 %814 }
 0x651   :  { %905 = vrot.lane.b32.xlu0 %v258_v32, %s1341_s0 }
 0x659   :  { %816 = vrot.lane.b32.xlu0 %v258_v32, %s1340_s18 }
 0x6a8   :  { %v676_v54 = vpop.xlane.xlu0 %675 }
 0x6a9   :  { %1261 = vrcp.f32 %v676_v54 }
 0x6aa   :  { %1263 = vrcp.f32 %v584_v56 }
 0x6af   :  { %v1262_v55 = vpop.eup %1261 }
 0x6b0   :  { %v678_v57 = vmul.f32 %v1262_v55, %v1260_v52  ;;  %v1264_v58 = vpop.eup %1263 }
 0x6b1   :  { %v586_v59 = vmul.f32 %v1264_v58, %v1258_v47  ;;  %v1057_v58 = vld [vmem:[%s1761_s11 + $0x18] sm:$0xff] }
 0x6b2   :  { %1198 = vmatmul.msk.f32.vlgmr.msrb.gmra.mxu2 %vm312_vm12, %v678_v57 }
 0x6bb   :  { %v588_v60 = vpop.permute.xlu0 %587 }
 0x6bc   :  { %608 = vmatpush.msrb.mxu3 %v588_v60  ;;  %v1055_v60 = vld [vmem:[%s1761_s11 + $0x8] sm:$0xff] }
 0x6bd   :  { %1194 = vmatmul.msk.f32.vlgmr.msrb.gmra.mxu3 %vm312_vm12, %v586_v59  ;;  %v1056_v59 = vld [vmem:[%s1761_s11 + $0x10] sm:$0xff] }
 0x6be   :  { %1199 = vmatpush.xpose.msk.msra.mxu3 %vm285_vm11, %v705_v61  ;;  %v1054_v61 = vld [vmem:[%s1761_s11] sm:$0xff] }
 0x6c3   :  { %v906_v20 = vpop.permute.xlu0 %905 }
 0x6c4   :  { %1208 = vmatpush.xpose.msk.msrb.mxu2 %vm285_vm11, %v906_v20 }
 0x6c5   :  { %1200 = vmatmul.msk.f32.vlgmr.msra.gmra.mxu3 %vm285_vm11, %v703_v62 }
 0x6cb   :  { %v817_v0 = vpop.permute.xlu0 %816 }
 0x6cc   :  { %1204 = vmatpush.xpose.msk.msrb.mxu3 %vm285_vm11, %v817_v0 }
 0x6cf   :  { %1205 = vmatmul.msk.f32.vlgmr.msrb.gmra.mxu3 %vm285_vm11, %v815_v1 }
 0x735   :  { %v699_v6 = vpop.f32.mrf.mxu2 }
 0x736   :  { %1203 = vmatmul.msk.f32.vlgmr.msra.gmra.mxu2 %vm285_vm11, %v699_v6 }
 0x73e   :  { %1209 = vmatmul.msk.f32.vlgmr.msrb.gmra.mxu2 %vm285_vm11, %v904_v7 }
 0x740   :  { %v610_v63 = vpop.f32.mrf.mxu3 }
 0x741   :  { %1195 = vmatmul.msk.f32.vlgmr.msrb.gmra.mxu0 %vm285_vm11, %v610_v63 }
 0x748   :  { %v727_v8 = vpop.f32.mrf.mxu3 }
 0x749   :  { %v730_v3 = vsel %vm312_vm12, %v727_v8, -inf }
 0x74a   :  { %731 = vmax.xlane.f32.xlu1 %v730_v3 }
 0x752   :  { %v839_v9 = vpop.f32.mrf.mxu3 }
 0x753   :  { %v842_v10 = vsel %vm312_vm12, %v839_v9, -inf }
 0x754   :  { %843 = vmax.xlane.f32.xlu2 %v842_v10  ;;  %v1691_v10 = vld [vmem:[%s1760_s10] ss:$0 sm:$0xff] }
 0x7b9   :  { %v1636_v11 = vpop.f32.mrf.mxu2 }
 0x7bd   :  { %v732_v13 = vpop.xlane.xlu1 %731 }
 0x7be   :  { %v733_v15 = vsub.f32 %v727_v8, %v732_v13  ;;  %v633_v16 = vpop.f32.mrf.mxu0  ;;  %v1686_v8 = vld [vmem:[%s1759_s9] ss:$0 sm:$0xff] }
 0x7bf   :  { %v636_v17 = vadd.f32 %v633_v16, %v1607_v41 }
 0x7c0   :  { %v734_v18 = vmul.f32 1.442695, %v733_v15 }
 0x7c1   :  { %v640_v21 = vadd.f32 %v1641_v14, %v636_v17  ;;  %v928_v22 = vpop.f32.mrf.mxu2 }
 0x7c2   :  { %1265 = vpow2.f32 %v734_v18  ;;  %v931_v19 = vsel %vm312_vm12, %v928_v22, -inf }
 0x7c3   :  { %641 = vst.msk [vmem:[#allocation2] sm:$0xff] %vm69_vm0, %v640_v21  ;;  %932 = vmax.xlane.f32.xlu0 %v931_v19 }
 0x7c7   :  { %v844_v23 = vpop.xlane.xlu2 %843 }
 0x7c8   :  { %v1266_v25 = vpop.eup %1265  ;;  %v845_v26 = vsub.f32 %v839_v9, %v844_v23 }
 0x7c9   :  { %v736_v28 = vsel %vm312_vm12, %v1266_v25, 0.0 }
 0x7ca   :  { %v846_v29 = vmul.f32 1.442695, %v845_v26  ;;  %737 = vadd.xlane.f32.xlu1 %v736_v28  ;;  %v994_v45 = vld [vmem:[#allocation2] sm:$0xff] }
 0x7cb   :  { %v1659_v46 = vadd.f32 %v994_v45, %v1439_v4 }
 0x7cc   :  { %1267 = vpow2.f32 %v846_v29  ;;  %v1116_v29 = vld [vmem:[%s1763_s13 + $0x38] sm:$0xff] }
 0x7cd   :  { %v998_v47 = vsel %vm69_vm0, %v1659_v46, 0.0  ;;  %1136 = vmatpush.msra.mxu2 %v1116_v29 }
 0x7d2   :  { %v1268_v30 = vpop.eup %1267 }
 0x7d3   :  { %v848_v31 = vsel %vm312_vm12, %v1268_v30, 0.0 }
 0x7d4   :  { %849 = vadd.xlane.f32.xlu2 %v848_v31  ;;  %v1111_v31 = vld [vmem:[%s1763_s13 + $0x10] sm:$0xff] }
 0x7e3   :  { %742 = vrot.lane.b32.xlu1 %v1536_v24, %s1339_s3 }
 0x7ec   :  { %853 = vrot.lane.b32.xlu2 %v1536_v24, %s1340_s18 }
 0x836   :  { %v933_v32 = vpop.xlane.xlu0 %932 }
 0x837   :  { %v934_v33 = vsub.f32 %v928_v22, %v933_v32  ;;  %v1110_v32 = vld [vmem:[%s1763_s13 + $0x8] sm:$0xff] }
 0x839   :  { %v935_v34 = vmul.f32 1.442695, %v934_v33  ;;  %v1109_v33 = vld [vmem:[%s1763_s13] sm:$0xff] }
 0x83b   :  { %1269 = vpow2.f32 %v935_v34  ;;  %v1233_v34 = vld [vmem:[%s1762_s12] ss:$0 sm:$0xff] }
 0x83d   :  { %v738_v37 = vpop.xlane.xlu1 %737 }
 0x83e   :  { %1271 = vrcp.f32 %v738_v37 }
 0x841   :  { %v1270_v35 = vpop.eup %1269 }
 0x842   :  { %v937_v36 = vsel %vm312_vm12, %v1270_v35, 0.0 }
 0x843   :  { %938 = vadd.xlane.f32.xlu0 %v937_v36 }
 0x844   :  { %v1272_v39 = vpop.eup %1271 }
 0x845   :  { %v740_v40 = vmul.f32 %v1272_v39, %v1266_v25 }
 0x847   :  { %v850_v38 = vpop.xlane.xlu2 %849 }
 0x848   :  { %1273 = vrcp.f32 %v850_v38 }
 0x84e   :  { %v1274_v43 = vpop.eup %1273 }
 0x84f   :  { %v854_v42 = vpop.permute.xlu2 %853  ;;  %v852_v44 = vmul.f32 %v1274_v43, %v1268_v30  ;;  %v1112_v30 = vld [vmem:[%s1763_s13 + $0x18] sm:$0xff] }
 0x855   :  { %v743_v41 = vpop.permute.xlu1 %742 }
 0x856   :  { %763 = vmatpush.msra.mxu0 %v743_v41 }
 0x857   :  { %1201 = vmatmul.msk.f32.vlgmr.msra.gmra.mxu0 %vm312_vm12, %v740_v40  ;;  %942 = vrot.lane.b32.xlu0 %v1536_v24, %s1341_s0 }
 0x858   :  { %874 = vmatpush.msrb.mxu0 %v854_v42 }
 0x85a   :  { %985 = vmatpush.msra.mxu0 %v200_v2 }
 0x85c   :  { %986 = vmatpush.msra.mxu0 %v199_v5 }
 0x85f   :  { %1206 = vmatmul.msk.f32.vlgmr.msrb.gmra.mxu0 %vm312_vm12, %v852_v44 }
 0x881   :  { %999 = vadd.xlane.f32.xlu0 %v998_v47 }
 0x8b6   :  { %v939_v48 = vpop.xlane.xlu0 %938 }
 0x8b7   :  { %1275 = vrcp.f32 %v939_v48 }
 0x8bd   :  { %v1276_v49 = vpop.eup %1275 }
 0x8be   :  { %v941_v50 = vmul.f32 %v1276_v49, %v1270_v35 }
 0x8c9   :  { %v943_v24 = vpop.permute.xlu0 %942 }
 0x8ca   :  { %963 = vmatpush.msra.mxu3 %v943_v24 }
 0x8cb   :  { %1210 = vmatmul.msk.f32.vlgmr.msra.gmra.mxu3 %vm312_vm12, %v941_v50 }
 0x8d4   :  { %v765_v51 = vpop.f32.mrf.mxu0 }
 0x8d5   :  { %1202 = vmatmul.msk.f32.vlgmr.msra.gmra.mxu1 %vm285_vm11, %v765_v51  ;;  %v1234_v51 = vld [vmem:[%s1764_s14] ss:$0 sm:$0xff]  ;;  %s1342_s14 = smov [#allocation6]  }
 0x8d6   :  { %1080 = vmatpush.msra.mxu1 %v1057_v58  ;;  %s1159_s19 = sshll.u32 %s1342_s14, 4  ;;  %s1160_s19 = int_to_ptr.vmem [resolvable:$true] %s1159_s19 }
 0x8d8   :  { %1081 = vmatpush.msra.mxu1 %v1056_v59 }
 0x8da   :  { %1082 = vmatpush.msra.mxu1 %v1055_v60 }
 0x8dc   :  { %v876_v52 = vpop.f32.mrf.mxu0  ;;  %1083 = vmatpush.msra.mxu1 %v1054_v61 }
 0x8dd   :  { %1207 = vmatmul.msk.f32.vlgmr.msrb.gmra.mxu1 %vm285_vm11, %v876_v52 }
 0x8f4   :  { %v1000_v4 = vpop.xlane.xlu0 %999 }
 0x8f5   :  { %v1004_v53 = vmul.f32 %v1000_v4, %v1443_v12 }
 0x8f7   :  { %v1006_v54 = vsub.f32 %v1659_v46, %v1004_v53 }
 0x8f9   :  { %v1008_v55 = vmul.f32 %v1006_v54, %v1006_v54 }
 0x8fb   :  { %v1010_v56 = vsel %vm69_vm0, %v1008_v55, 0.0 }
 0x8fc   :  { %1011 = vadd.xlane.f32.xlu2 %v1010_v56 }
 0x94e   :  { %v965_v57 = vpop.f32.mrf.mxu3 }
 0x94f   :  { %1211 = vmatmul.msk.f32.vlgmr.msra.gmra.mxu0 %vm285_vm11, %v965_v57 }
 0x952   :  { %v788_v16 = vpop.f32.mrf.mxu1 }
 0x953   :  { %v812_v18 = vadd.f32 %v1636_v11, %v788_v16  ;;  %v1115_v11 = vld [vmem:[%s1763_s13 + $0x30] sm:$0xff] }
 0x954   :  { %1137 = vmatpush.msra.mxu2 %v1115_v11 }
 0x95a   :  { %v899_v17 = vpop.f32.mrf.mxu1 }
 0x95b   :  { %v902_v21 = vadd.f32 %v899_v17, %v812_v18 }
 0x96f   :  { %v1012_v20 = vpop.xlane.xlu2 %1011 }
 0x970   :  { %v1016_v62 = vmul.f32 %v1012_v20, %v1443_v12 }
 0x972   :  { %v1018_v0 = vadd.f32 1e-05, %v1016_v62 }
 0x974   :  { %1277 = vrsqrt.f32 %v1018_v0  ;;  %vm1026_vm2 = vweird.f32 %v1018_v0 }
 0x97a   :  { %v1278_v1 = vpop.eup %1277 }
 0x97b   :  { %v1021_v2 = vmul.f32 %v1278_v1, %v1018_v0  ;;  %vm1027_vm1 = vweird.f32 %v1278_v1 }
 0x97c   :  { %vm1028_vm3 = vmor %vm1026_vm2, %vm1027_vm1 }
 0x97d   :  { %v1022_v5 = vmul.f32 %v1278_v1, %v1021_v2 }
 0x97f   :  { %v1023_v6 = vmul.f32 0.5, %v1022_v5 }
 0x981   :  { %v1024_v7 = vsub.f32 1.5, %v1023_v6 }
 0x983   :  { %v1025_v63 = vmul.f32 %v1278_v1, %v1024_v7 }
 0x985   :  { %v1029_v3 = vsel %vm1028_vm3, %v1278_v1, %v1025_v63 }
 0x986   :  { %v1040_v9 = vmul.f32 %v1029_v3, %v1006_v54 }
 0x988   :  { %v1046_v13 = vmul.f32 %v1686_v8, %v1040_v9 }
 0x98a   :  { %v1052_v15 = vadd.f32 %v1691_v10, %v1046_v13 }
 0x98c   :  { %1212 = vmatmul.msk.f32.vlgmr.msra.gmra.mxu1 %vm69_vm0, %v1052_v15 }
 0x9cc   :  { %v988_v22 = vpop.f32.mrf.mxu0 }
 0x9cd   :  { %v991_v19 = vadd.f32 %v988_v22, %v902_v21 }
 0x9cf   :  { %v992_v23 = vadd.f32 %v1641_v14, %v991_v19  ;;  %v1114_v14 = vld [vmem:[%s1763_s13 + $0x28] sm:$0xff] }
 0x9d0   :  { %1138 = vmatpush.msra.mxu2 %v1114_v14 }
 0x9d1   :  { %993 = vst.msk [vmem:[#allocation2 + $0x8] sm:$0xff] %vm69_vm0, %v992_v23 }
 0x9d8   :  { %v995_v25 = vld [vmem:[#allocation2 + $0x8] sm:$0xff] }
 0x9d9   :  { %v1700_v26 = vadd.f32 %v995_v25, %v1543_v27  ;;  %v1113_v27 = vld [vmem:[%s1763_s13 + $0x20] sm:$0xff] }
 0x9da   :  { %1139 = vmatpush.msra.mxu2 %v1113_v27 }
 0x9db   :  { %v1001_v28 = vsel %vm69_vm0, %v1700_v26, 0.0 }
 0x9dc   :  { %1002 = vadd.xlane.f32.xlu1 %v1001_v28  ;;  %1140 = vmatpush.msra.mxu2 %v1112_v30 }
 0x9de   :  { %1141 = vmatpush.msra.mxu2 %v1111_v31 }
 0x9e0   :  { %1142 = vmatpush.msra.mxu2 %v1110_v32 }
 0x9e2   :  { %1143 = vmatpush.msra.mxu2 %v1109_v33 }
 0xa09   :  { %v1085_v35 = vpop.f32.mrf.mxu1 }
 0xa0a   :  { %v1086_v36 = vadd.f32 %v1233_v34, %v1085_v35 }
 0xa0c   :  { %v1093_v37 = vmul.f32 0.044715, %v1086_v36  ;;  %v1091_v43 = vmul.f32 0.5, %v1086_v36 }
 0xa0e   :  { %v1095_v38 = vmul.f32 %v1093_v37, %v1086_v36 }
 0xa10   :  { %v1097_v39 = vmul.f32 %v1095_v38, %v1086_v36 }
 0xa12   :  { %v1099_v40 = vadd.f32 %v1097_v39, %v1086_v36 }
 0xa14   :  { %v1101_v41 = vmul.f32 0.7978846, %v1099_v40 }
 0xa16   :  { %1279 = vtanh.f32 %v1101_v41 }
 0xa1c   :  { %v1280_v42 = vpop.eup %1279 }
 0xa1d   :  { %v1105_v44 = vadd.f32 1.0, %v1280_v42 }
 0xa1f   :  { %v1107_v45 = vmul.f32 %v1105_v44, %v1091_v43 }
 0xa21   :  { %1214 = vmatmul.msk.f32.vlgmr.msra.gmra.mxu2 %vm1121_vm4, %v1107_v45 }
 0xa4f   :  { %v1003_v47 = vpop.xlane.xlu1 %1002 }
 0xa50   :  { %v1005_v48 = vmul.f32 %v1003_v47, %v1443_v12 }
 0xa52   :  { %v1007_v49 = vsub.f32 %v1700_v26, %v1005_v48 }
 0xa54   :  { %v1009_v50 = vmul.f32 %v1007_v49, %v1007_v49 }
 0xa56   :  { %v1013_v24 = vsel %vm69_vm0, %v1009_v50, 0.0 }
 0xa57   :  { %1014 = vadd.xlane.f32.xlu0 %v1013_v24 }
 0xaa4   :  { %v1145_v52 = vpop.f32.mrf.mxu2 }
 0xaa5   :  { %v1146_v4 = vadd.f32 %v1234_v51, %v1145_v52 }
 0xaa7   :  { %v1151_v53 = vadd.f32 %v1146_v4, %v1659_v46 }
 0xaa9   :  { %1153 = vst.msk [vmem:[#allocation6] sm:$0xff] %vm69_vm0, %v1151_v53 }
 0xaca   :  { %v1015_v54 = vpop.xlane.xlu0 %1014 }
 0xacb   :  { %v1017_v55 = vmul.f32 %v1015_v54, %v1443_v12 }
 0xacd   :  { %v1019_v56 = vadd.f32 1e-05, %v1017_v55 }
 0xacf   :  { %1281 = vrsqrt.f32 %v1019_v56  ;;  %vm1036_vm6 = vweird.f32 %v1019_v56 }
 0xad5   :  { %v1282_v57 = vpop.eup %1281 }
 0xad6   :  { %v1031_v58 = vmul.f32 %v1282_v57, %v1019_v56  ;;  %vm1037_vm5 = vweird.f32 %v1282_v57 }
 0xad7   :  { %vm1038_vm7 = vmor %vm1036_vm6, %vm1037_vm5 }
 0xad8   :  { %v1032_v59 = vmul.f32 %v1282_v57, %v1031_v58 }
 0xada   :  { %v1033_v60 = vmul.f32 0.5, %v1032_v59 }
 0xadc   :  { %v1034_v61 = vsub.f32 1.5, %v1033_v60 }
 0xade   :  { %v1035_v20 = vmul.f32 %v1282_v57, %v1034_v61 }
 0xae0   :  { %v1039_v62 = vsel %vm1038_vm7, %v1282_v57, %v1035_v20 }
 0xae1   :  { %v1041_v0 = vmul.f32 %v1039_v62, %v1007_v49 }
 0xae3   :  { %v1047_v46 = vmul.f32 %v1686_v8, %v1041_v0 }
 0xae5   :  { %v1053_v1 = vadd.f32 %v1691_v10, %v1047_v46 }
 0xae7   :  { %1213 = vmatmul.msk.f32.gmra.mxu1 %vm69_vm0, %v1053_v1 }
 0xb64   :  { %v1088_v12 = vpop.f32.mrf.mxu1 }
 0xb65   :  { %v1089_v2 = vadd.f32 %v1233_v34, %v1088_v12 }
 0xb67   :  { %v1094_v5 = vmul.f32 0.044715, %v1089_v2  ;;  %v1092_v13 = vmul.f32 0.5, %v1089_v2 }
 0xb69   :  { %v1096_v6 = vmul.f32 %v1094_v5, %v1089_v2 }
 0xb6b   :  { %v1098_v7 = vmul.f32 %v1096_v6, %v1089_v2 }
 0xb6d   :  { %v1100_v63 = vadd.f32 %v1098_v7, %v1089_v2 }
 0xb6f   :  { %v1102_v3 = vmul.f32 0.7978846, %v1100_v63 }
 0xb71   :  { %1283 = vtanh.f32 %v1102_v3 }
 0xb77   :  { %v1284_v9 = vpop.eup %1283 }
 0xb78   :  { %v1106_v15 = vadd.f32 1.0, %v1284_v9 }
 0xb7a   :  { %v1108_v16 = vmul.f32 %v1106_v15, %v1092_v13 }
 0xb7c   :  { %1215 = vmatmul.msk.f32.gmra.mxu2 %vm1121_vm4, %v1108_v16 }
 0xbff   :  { %v1148_v8 = vpop.f32.mrf.mxu2 }
 0xc00   :  { %v1149_v10 = vadd.f32 %v1234_v51, %v1148_v8 }
 0xc02   :  { %v1152_v17 = vadd.f32 %v1149_v10, %v1700_v26 }
 0xc04   :  { %1154 = vst.msk [vmem:[#allocation6 + $0x8] sm:$0xff] %vm69_vm0, %v1152_v17 }
 0xc05   :  { %1167 = dma.vmem_to_hbm [thread:$0]  %s1160_s19, 256, %s1162_s21, [#allocation5], %s1343_s22, %s1343_s22, %s1344_s23  }
 0xc06   :  { %1335 = dma.done.wait [#allocation5], 256  }
 0xc07   :  { %1336 = vsyncadd [#allocation5], 4294967040 }
 0xc08   :  { %1172 = vsyncpa [#allocation4], 1 }
 0xc09   :  { %1173 = vsyncpa [#allocation5], 1 }

</bundles_post_ra>
